<compile_context>
chip_gen: v5e
topology: v5e:2x2
jax: 0.10.0
libtpu: 0.0.40
codegen_flags: <defaults>
</compile_context>

<pallas_src>
import functools

import jax
import jax.numpy as jnp
from jax.experimental import pallas as pl
from jax.experimental.pallas import tpu as pltpu

NEG_SLOPE = 0.2
BN_EPS = 1e-5


def _round_up(x, m):
    return (x + m - 1) // m * m


def _vmem_capacity_bytes():
    try:
        return int(pltpu.get_tpu_info().vmem_capacity_bytes)
    except Exception:
        return 64 * 1024 * 1024  # conservative default (v7x per-core VMEM)


def _pick_nb(n, ohw, per_image_block_bytes, target_cols=1024, max_block_bytes=4 << 20):
    """Largest divisor of n keeping per-step blocks small while reaching ~target_cols lanes."""
    best = 1
    for cand in range(1, n + 1):
        if n % cand:
            continue
        if cand * per_image_block_bytes > max_block_bytes:
            break
        best = cand
        if cand * ohw >= target_cols:
            break
    return best


# ---------------- fused Pallas kernel ----------------

def _conv_bn_lrelu_kernel(x_ref, w_ref, gamma_ref, beta_ref, o_ref,
                          y_scr, sum_scr, ssq_scr, mean_scr, scale_scr, shift_scr,
                          *, cout, cin, kh, kw, oh, ow, wp, stride, nb, m_total):
    """Three-phase fused kernel over grid (phase=3, image blocks).

    phase 0: in-kernel im2col conv (KH*KW shifted-slab matmuls, bf16 in / f32 acc),
             stash the compacted pre-BN activation in VMEM, accumulate per-channel sum;
             fold the batch mean on the last block.
    phase 1: centered sum-of-squares (two-pass variance), fold BN into (scale, shift).
    phase 2: z = y*scale + shift, LeakyReLU, lane-dense (Cout, OH*OW) store.
    """
    phase = pl.program_id(0)
    blk = pl.program_id(1)
    nblk = pl.num_programs(1)
    ohw = oh * ow
    lw = oh * wp  # wide (junk-carrying) row-major length per image

    # ---- phase 0: conv + per-channel sum ----
    @pl.when(jnp.logical_and(phase == 0, blk == 0))
    def _init_sum():
        sum_scr[...] = jnp.zeros_like(sum_scr)

    @pl.when(phase == 0)
    def _conv_and_sum():
        for b in range(nb):                       # static unroll over images in this block
            img = blk * nb + b
            xv = x_ref[b]                         # (Cin, FL) bf16 halo'd flattened slab
            acc = jnp.zeros((cout, lw), jnp.float32)
            for i in range(kh):
                for j in range(kw):
                    off = i * wp + j
                    if stride == 1:
                        slab = xv[:, off:off + lw]
                    else:
                        # TODO(synk): stride>1 path relies on a strided lane slice.
                        slab = jax.lax.slice(
                            xv, (0, off), (cin, off + stride * (lw - 1) + 1), (1, stride))
                    acc = acc + jnp.dot(w_ref[i * kw + j], slab,
                                        preferred_element_type=jnp.float32)
            # Drop the (Wp-OW) junk columns of each output row -> lane-dense (Cout, OH*OW).
            y = jnp.concatenate([acc[:, r * wp:r * wp + ow] for r in range(oh)], axis=1)
            y_scr[img] = y.astype(y_scr.dtype)
            sum_scr[...] += jnp.sum(y, axis=1, keepdims=True)

    @pl.when(jnp.logical_and(phase == 0, blk == nblk - 1))
    def _fold_mean():
        mean_scr[...] = sum_scr[...] * (1.0 / m_total)

    # ---- phase 1: centered sum of squares (two-pass variance) ----
    @pl.when(jnp.logical_and(phase == 1, blk == 0))
    def _init_ssq():
        ssq_scr[...] = jnp.zeros_like(ssq_scr)

    @pl.when(phase == 1)
    def _centered_ssq():
        for b in range(nb):
            img = blk * nb + b
            d = y_scr[img].astype(jnp.float32) - mean_scr[...]
            ssq_scr[...] += jnp.sum(d * d, axis=1, keepdims=True)

    @pl.when(jnp.logical_and(phase == 1, blk == nblk - 1))
    def _fold_bn():
        var = ssq_scr[...] * (1.0 / m_total)
        inv = jax.lax.rsqrt(var + BN_EPS)
        scale = gamma_ref[...] * inv
        scale_scr[...] = scale
        shift_scr[...] = beta_ref[...] - mean_scr[...] * scale

    # ---- phase 2: normalize + LeakyReLU, lane-dense store ----
    @pl.when(phase == 2)
    def _normalize():
        for b in range(nb):
            img = blk * nb + b
            z = y_scr[img].astype(jnp.float32) * scale_scr[...] + shift_scr[...]
            o_ref[b] = jnp.where(z >= 0, z, NEG_SLOPE * z)


# ---------------- glue ----------------

def conv_block_forward(x, weight, gamma, beta, *, stride, padding):
    """x: (N, Cin, H, W); weight: (Cout, Cin, KH, KW) (PyTorch conventions); f32 in/out."""
    n, cin, h, w = x.shape
    cout, cin_w, kh, kw = weight.shape
    assert cin == cin_w
    hp, wp = h + 2 * padding, w + 2 * padding
    assert hp >= kh and wp >= kw
    oh = (hp - kh) // stride + 1
    ow = (wp - kw) // stride + 1
    ohw = oh * ow
    m_total = n * ohw

    lw = oh * wp
    fl = max(hp * wp, (kh - 1) * wp + (kw - 1) + stride * (lw - 1) + 1)

    # Halo'd, flattened, bf16 input slab: one cheap XLA pass over ~1.3x the input bytes
    # (vs. the former 9x im2col patches materialization + extra HBM round trips).
    xp = jnp.pad(x, ((0, 0), (0, 0), (padding, padding), (padding, padding)))
    xflat = xp.reshape(n, cin, hp * wp)
    if fl > hp * wp:
        xflat = jnp.pad(xflat, ((0, 0), (0, 0), (0, fl - hp * wp)))
    xflat = xflat.astype(jnp.bfloat16)

    wt = weight.transpose(2, 3, 0, 1).reshape(kh * kw, cout, cin).astype(jnp.bfloat16)
    gamma2d = gamma.reshape(cout, 1).astype(jnp.float32)
    beta2d = beta.reshape(cout, 1).astype(jnp.float32)

    # ---- block / VMEM budgeting (generation-aware) ----
    x_img_bytes = _round_up(cin, 16) * _round_up(fl, 128) * 2
    o_img_bytes = _round_up(cout, 8) * _round_up(ohw, 128) * 4
    nb = _pick_nb(n, ohw, max(x_img_bytes, o_img_bytes))
    nblk = n // nb

    phys_vmem = _vmem_capacity_bytes()
    w_bytes = kh * kw * _round_up(cout, 16) * _round_up(cin, 128) * 2
    block_bytes = 2 * nb * x_img_bytes + 2 * nb * o_img_bytes + 2 * w_bytes + (1 << 20)
    y_f32 = n * _round_up(cout, 8) * _round_up(ohw, 128) * 4
    y_bf16 = n * _round_up(cout, 16) * _round_up(ohw, 128) * 2
    y_budget = int(0.75 * phys_vmem) - block_bytes
    if y_f32 <= y_budget:
        y_dtype, y_bytes = jnp.float32, y_f32
    elif y_bf16 <= y_budget:
        y_dtype, y_bytes = jnp.bfloat16, y_bf16   # halves resident scratch (v7x: 64 MiB VMEM)
    else:
        # TODO(synk): for very large N*OH*OW, stream the pre-BN activation through HBM
        # (two-pass with per-block partial stats) instead of keeping it VMEM-resident.
        raise NotImplementedError("pre-BN activation does not fit in VMEM")

    needed = y_bytes + block_bytes
    vmem_limit = int(min(0.9 * phys_vmem, max(2 * needed, 32 << 20)))
    vmem_limit = max(vmem_limit, needed + (4 << 20))

    kernel = functools.partial(
        _conv_bn_lrelu_kernel, cout=cout, cin=cin, kh=kh, kw=kw, oh=oh, ow=ow,
        wp=wp, stride=stride, nb=nb, m_total=m_total)

    # TODO(synk): on v7x, split the image blocks across the two TensorCores (per-core
    # partial sums + cross-core combine); the carried scratch pins this to one core.
    out_flat = pl.pallas_call(
        kernel,
        out_shape=jax.ShapeDtypeStruct((n, cout, ohw), jnp.float32),
        grid_spec=pltpu.PrefetchScalarGridSpec(
            num_scalar_prefetch=0,
            grid=(3, nblk),
            in_specs=[
                # Halo'd input slab: walked during phase 0, pinned to the last block
                # afterwards so phases 1/2 trigger no input DMA at all.
                pl.BlockSpec((nb, cin, fl),
                             lambda p, b: (jnp.where(p == 0, b, nblk - 1), 0, 0)),
                pl.BlockSpec((kh * kw, cout, cin), lambda p, b: (0, 0, 0)),  # weights
                pl.BlockSpec((cout, 1), lambda p, b: (0, 0)),                # gamma
                pl.BlockSpec((cout, 1), lambda p, b: (0, 0)),                # beta
            ],
            # Output stays pinned (and unwritten) during phases 0/1, then walks the image
            # blocks during phase 2 -> only fully-written blocks are ever flushed to HBM.
            out_specs=pl.BlockSpec((nb, cout, ohw),
                                   lambda p, b: (jnp.where(p == 2, b, 0), 0, 0)),
            scratch_shapes=[
                pltpu.VMEM((n, cout, ohw), y_dtype),     # resident pre-BN activation
                pltpu.VMEM((cout, 1), jnp.float32),      # sum
                pltpu.VMEM((cout, 1), jnp.float32),      # centered sum of squares
                pltpu.VMEM((cout, 1), jnp.float32),      # mean
                pltpu.VMEM((cout, 1), jnp.float32),      # folded BN scale
                pltpu.VMEM((cout, 1), jnp.float32),      # folded BN shift
            ],
        ),
        compiler_params=pltpu.CompilerParams(
            dimension_semantics=("arbitrary", "arbitrary"),
            vmem_limit_bytes=vmem_limit),
    )(xflat, wt, gamma2d, beta2d)

    # (N, Cout, OH*OW) -> (N, Cout, OH, OW): contiguous split, no data movement.
    return out_flat.reshape(n, cout, oh, ow)


def reference(x, weight, gamma, beta, *, stride, padding):
    y = jax.lax.conv_general_dilated(
        x, weight, (stride, stride),
        [(padding, padding), (padding, padding)],
        dimension_numbers=("NCHW", "OIHW", "NCHW"))
    mean = y.mean(axis=(0, 2, 3), keepdims=True)
    var = ((y - mean) ** 2).mean(axis=(0, 2, 3), keepdims=True)
    z = (y - mean) / jnp.sqrt(var + BN_EPS)
    z = z * gamma.reshape(1, -1, 1, 1) + beta.reshape(1, -1, 1, 1)
    return jnp.where(z >= 0, z, NEG_SLOPE * z)


if __name__ == "__main__":
    # ConvBlock(in_channels=4, out_channels=8, kernel_size=3, stride=1, padding=1)
    N, CIN, H, W = 2, 4, 16, 16
    COUT, KS, STRIDE, PAD = 8, 3, 1, 1

    key = jax.random.PRNGKey(0)
    kx, kw_key = jax.random.split(key, 2)
    x = jax.random.normal(kx, (N, CIN, H, W), dtype=jnp.float32)
    weight = 0.1 * jax.random.normal(kw_key, (COUT, CIN, KS, KS), dtype=jnp.float32)
    gamma = jnp.ones((COUT,), dtype=jnp.float32)   # BatchNorm2d default init
    beta = jnp.zeros((COUT,), dtype=jnp.float32)

    out = conv_block_forward(x, weight, gamma, beta, stride=STRIDE, padding=PAD)
    out = jax.block_until_ready(out)
    assert out.shape == (N, COUT, H, W)

    # Tight check: f32 reference evaluated on bf16-rounded inputs (the precision the
    # kernel feeds the MXU; accumulation is f32 in both cases).
    xb = x.astype(jnp.bfloat16).astype(jnp.float32)
    wb = weight.astype(jnp.bfloat16).astype(jnp.float32)
    ref_bf = reference(xb, wb, gamma, beta, stride=STRIDE, padding=PAD)
    assert jnp.allclose(out, ref_bf, atol=2e-3, rtol=2e-3), "mismatch vs bf16-input reference"

    # Loose sanity check vs the pure-f32 PyTorch-semantics reference.
    ref = reference(x, weight, gamma, beta, stride=STRIDE, padding=PAD)
    assert jnp.allclose(out, ref, atol=1e-1, rtol=1e-1), "mismatch vs f32 reference"

    print("KERNEL_OK")
</pallas_src>

<mosaic_0001>
module attributes {stable_mosaic.version = 11 : i64} {
  func.func @_conv_bn_lrelu_kernel(%arg0: i32, %arg1: i32, %arg2: memref<2x4x326xbf16, #tpu.memory_space<vmem>>, %arg3: memref<9x8x4xbf16, #tpu.memory_space<vmem>>, %arg4: memref<8x1xf32, #tpu.memory_space<vmem>>, %arg5: memref<8x1xf32, #tpu.memory_space<vmem>>, %arg6: memref<2x8x256xf32, #tpu.memory_space<vmem>>, %arg7: memref<2x8x256xf32, #tpu.memory_space<vmem>>, %arg8: memref<8x1xf32, #tpu.memory_space<vmem>>, %arg9: memref<8x1xf32, #tpu.memory_space<vmem>>, %arg10: memref<8x1xf32, #tpu.memory_space<vmem>>, %arg11: memref<8x1xf32, #tpu.memory_space<vmem>>, %arg12: memref<8x1xf32, #tpu.memory_space<vmem>>) attributes {dimension_semantics = [#tpu.dimension_semantics<arbitrary>, #tpu.dimension_semantics<arbitrary>], iteration_bounds = array<i64: 3, 1>, scalar_prefetch = 0 : i64, scratch_operands = 6 : i64, tpu.core_type = #tpu.core_type<tc>, window_params = [{transform_indices = @transform_0, window_bounds = array<i64: 2, 4, 326>}, {pipeline_mode = #tpu.pipeline_mode<synchronous>, transform_indices = @transform_1, window_bounds = array<i64: 9, 8, 4>}, {pipeline_mode = #tpu.pipeline_mode<synchronous>, transform_indices = @transform_2, window_bounds = array<i64: 8, 1>}, {pipeline_mode = #tpu.pipeline_mode<synchronous>, transform_indices = @transform_3, window_bounds = array<i64: 8, 1>}, {transform_indices = @transform_4, window_bounds = array<i64: 2, 8, 256>}]} {
    %c0_i32 = arith.constant 0 : i32
    %0 = arith.cmpi eq, %arg0, %c0_i32 : i32
    %c0_i32_0 = arith.constant 0 : i32
    %1 = arith.cmpi eq, %arg1, %c0_i32_0 : i32
    %2 = arith.andi %0, %1 : i1
    %3 = arith.extui %2 : i1 to i32
    %c0_i32_1 = arith.constant 0 : i32
    %4 = arith.cmpi ne, %3, %c0_i32_1 : i32
    scf.if %4 {
      %cst = arith.constant 0.000000e+00 : f32
      %29 = vector.broadcast %cst : f32 to vector<8x1xf32>
      %c0 = arith.constant 0 : index
      %c0_15 = arith.constant 0 : index
      %30 = vector.load %arg8[%c0, %c0_15] : memref<8x1xf32, #tpu.memory_space<vmem>>, vector<8x1xf32>
      tpu.vector_store %arg8[%c0, %c0_15], %29 {strides = array<i32>} : memref<8x1xf32, #tpu.memory_space<vmem>>, vector<8x1xf32>,
    } else {
    }
    %c0_i32_2 = arith.constant 0 : i32
    %5 = arith.cmpi eq, %arg0, %c0_i32_2 : i32
    %6 = arith.extui %5 : i1 to i32
    %c0_i32_3 = arith.constant 0 : i32
    %7 = arith.cmpi ne, %6, %c0_i32_3 : i32
    scf.if %7 {
      %c2_i32_15 = arith.constant 2 : i32
      %29 = arith.muli %arg1, %c2_i32_15 : i32
      %c0_i32_16 = arith.constant 0 : i32
      %30 = arith.addi %29, %c0_i32_16 : i32
      %c0 = arith.constant 0 : index
      %c0_17 = arith.constant 0 : index
      %c0_18 = arith.constant 0 : index
      %31 = vector.load %arg2[%c0, %c0_17, %c0_18] : memref<2x4x326xbf16, #tpu.memory_space<vmem>>, vector<1x4x326xbf16>
      %32 = vector.shape_cast %31 : vector<1x4x326xbf16> to vector<4x326xbf16>
      %cst = arith.constant 0.000000e+00 : f32
      %33 = vector.broadcast %cst : f32 to vector<8x288xf32>
      %34 = vector.extract_strided_slice %32 {offsets = [0, 0], sizes = [4, 288], strides = [1, 1]} : vector<4x326xbf16> to vector<4x288xbf16>
      %c0_19 = arith.constant 0 : index
      %c0_20 = arith.constant 0 : index
      %c0_21 = arith.constant 0 : index
      %35 = vector.load %arg3[%c0_19, %c0_20, %c0_21] : memref<9x8x4xbf16, #tpu.memory_space<vmem>>, vector<1x8x4xbf16>
      %36 = vector.shape_cast %35 : vector<1x8x4xbf16> to vector<8x4xbf16>
      %cst_22 = arith.constant dense<0.000000e+00> : vector<8x288xf32>
      %37 = tpu.matmul %36, %34, %cst_22 {dimension_numbers = #tpu.dot_dimension_numbers<[1], [0], [0], [1], [0, 0, 1, 1], [], []>} : vector<8x4xbf16>, vector<4x288xbf16>, vector<8x288xf32> -> vector<8x288xf32>
      %38 = arith.addf %33, %37 : vector<8x288xf32>
      %39 = vector.extract_strided_slice %32 {offsets = [0, 1], sizes = [4, 288], strides = [1, 1]} : vector<4x326xbf16> to vector<4x288xbf16>
      %c1 = arith.constant 1 : index
      %c0_23 = arith.constant 0 : index
      %c0_24 = arith.constant 0 : index
      %40 = vector.load %arg3[%c1, %c0_23, %c0_24] : memref<9x8x4xbf16, #tpu.memory_space<vmem>>, vector<1x8x4xbf16>
      %41 = vector.shape_cast %40 : vector<1x8x4xbf16> to vector<8x4xbf16>
      %cst_25 = arith.constant dense<0.000000e+00> : vector<8x288xf32>
      %42 = tpu.matmul %41, %39, %cst_25 {dimension_numbers = #tpu.dot_dimension_numbers<[1], [0], [0], [1], [0, 0, 1, 1], [], []>} : vector<8x4xbf16>, vector<4x288xbf16>, vector<8x288xf32> -> vector<8x288xf32>
      %43 = arith.addf %38, %42 : vector<8x288xf32>
      %44 = vector.extract_strided_slice %32 {offsets = [0, 2], sizes = [4, 288], strides = [1, 1]} : vector<4x326xbf16> to vector<4x288xbf16>
      %c2 = arith.constant 2 : index
      %c0_26 = arith.constant 0 : index
      %c0_27 = arith.constant 0 : index
      %45 = vector.load %arg3[%c2, %c0_26, %c0_27] : memref<9x8x4xbf16, #tpu.memory_space<vmem>>, vector<1x8x4xbf16>
      %46 = vector.shape_cast %45 : vector<1x8x4xbf16> to vector<8x4xbf16>
      %cst_28 = arith.constant dense<0.000000e+00> : vector<8x288xf32>
      %47 = tpu.matmul %46, %44, %cst_28 {dimension_numbers = #tpu.dot_dimension_numbers<[1], [0], [0], [1], [0, 0, 1, 1], [], []>} : vector<8x4xbf16>, vector<4x288xbf16>, vector<8x288xf32> -> vector<8x288xf32>
      %48 = arith.addf %43, %47 : vector<8x288xf32>
      %49 = vector.extract_strided_slice %32 {offsets = [0, 18], sizes = [4, 288], strides = [1, 1]} : vector<4x326xbf16> to vector<4x288xbf16>
      %c3 = arith.constant 3 : index
      %c0_29 = arith.constant 0 : index
      %c0_30 = arith.constant 0 : index
      %50 = vector.load %arg3[%c3, %c0_29, %c0_30] : memref<9x8x4xbf16, #tpu.memory_space<vmem>>, vector<1x8x4xbf16>
      %51 = vector.shape_cast %50 : vector<1x8x4xbf16> to vector<8x4xbf16>
      %cst_31 = arith.constant dense<0.000000e+00> : vector<8x288xf32>
      %52 = tpu.matmul %51, %49, %cst_31 {dimension_numbers = #tpu.dot_dimension_numbers<[1], [0], [0], [1], [0, 0, 1, 1], [], []>} : vector<8x4xbf16>, vector<4x288xbf16>, vector<8x288xf32> -> vector<8x288xf32>
      %53 = arith.addf %48, %52 : vector<8x288xf32>
      %54 = vector.extract_strided_slice %32 {offsets = [0, 19], sizes = [4, 288], strides = [1, 1]} : vector<4x326xbf16> to vector<4x288xbf16>
      %c4 = arith.constant 4 : index
      %c0_32 = arith.constant 0 : index
      %c0_33 = arith.constant 0 : index
      %55 = vector.load %arg3[%c4, %c0_32, %c0_33] : memref<9x8x4xbf16, #tpu.memory_space<vmem>>, vector<1x8x4xbf16>
      %56 = vector.shape_cast %55 : vector<1x8x4xbf16> to vector<8x4xbf16>
      %cst_34 = arith.constant dense<0.000000e+00> : vector<8x288xf32>
      %57 = tpu.matmul %56, %54, %cst_34 {dimension_numbers = #tpu.dot_dimension_numbers<[1], [0], [0], [1], [0, 0, 1, 1], [], []>} : vector<8x4xbf16>, vector<4x288xbf16>, vector<8x288xf32> -> vector<8x288xf32>
      %58 = arith.addf %53, %57 : vector<8x288xf32>
      %59 = vector.extract_strided_slice %32 {offsets = [0, 20], sizes = [4, 288], strides = [1, 1]} : vector<4x326xbf16> to vector<4x288xbf16>
      %c5 = arith.constant 5 : index
      %c0_35 = arith.constant 0 : index
      %c0_36 = arith.constant 0 : index
      %60 = vector.load %arg3[%c5, %c0_35, %c0_36] : memref<9x8x4xbf16, #tpu.memory_space<vmem>>, vector<1x8x4xbf16>
      %61 = vector.shape_cast %60 : vector<1x8x4xbf16> to vector<8x4xbf16>
      %cst_37 = arith.constant dense<0.000000e+00> : vector<8x288xf32>
      %62 = tpu.matmul %61, %59, %cst_37 {dimension_numbers = #tpu.dot_dimension_numbers<[1], [0], [0], [1], [0, 0, 1, 1], [], []>} : vector<8x4xbf16>, vector<4x288xbf16>, vector<8x288xf32> -> vector<8x288xf32>
      %63 = arith.addf %58, %62 : vector<8x288xf32>
      %64 = vector.extract_strided_slice %32 {offsets = [0, 36], sizes = [4, 288], strides = [1, 1]} : vector<4x326xbf16> to vector<4x288xbf16>
      %c6 = arith.constant 6 : index
      %c0_38 = arith.constant 0 : index
      %c0_39 = arith.constant 0 : index
      %65 = vector.load %arg3[%c6, %c0_38, %c0_39] : memref<9x8x4xbf16, #tpu.memory_space<vmem>>, vector<1x8x4xbf16>
      %66 = vector.shape_cast %65 : vector<1x8x4xbf16> to vector<8x4xbf16>
      %cst_40 = arith.constant dense<0.000000e+00> : vector<8x288xf32>
      %67 = tpu.matmul %66, %64, %cst_40 {dimension_numbers = #tpu.dot_dimension_numbers<[1], [0], [0], [1], [0, 0, 1, 1], [], []>} : vector<8x4xbf16>, vector<4x288xbf16>, vector<8x288xf32> -> vector<8x288xf32>
      %68 = arith.addf %63, %67 : vector<8x288xf32>
      %69 = vector.extract_strided_slice %32 {offsets = [0, 37], sizes = [4, 288], strides = [1, 1]} : vector<4x326xbf16> to vector<4x288xbf16>
      %c7 = arith.constant 7 : index
      %c0_41 = arith.constant 0 : index
      %c0_42 = arith.constant 0 : index
      %70 = vector.load %arg3[%c7, %c0_41, %c0_42] : memref<9x8x4xbf16, #tpu.memory_space<vmem>>, vector<1x8x4xbf16>
      %71 = vector.shape_cast %70 : vector<1x8x4xbf16> to vector<8x4xbf16>
      %cst_43 = arith.constant dense<0.000000e+00> : vector<8x288xf32>
      %72 = tpu.matmul %71, %69, %cst_43 {dimension_numbers = #tpu.dot_dimension_numbers<[1], [0], [0], [1], [0, 0, 1, 1], [], []>} : vector<8x4xbf16>, vector<4x288xbf16>, vector<8x288xf32> -> vector<8x288xf32>
      %73 = arith.addf %68, %72 : vector<8x288xf32>
      %74 = vector.extract_strided_slice %32 {offsets = [0, 38], sizes = [4, 288], strides = [1, 1]} : vector<4x326xbf16> to vector<4x288xbf16>
      %c8 = arith.constant 8 : index
      %c0_44 = arith.constant 0 : index
      %c0_45 = arith.constant 0 : index
      %75 = vector.load %arg3[%c8, %c0_44, %c0_45] : memref<9x8x4xbf16, #tpu.memory_space<vmem>>, vector<1x8x4xbf16>
      %76 = vector.shape_cast %75 : vector<1x8x4xbf16> to vector<8x4xbf16>
      %cst_46 = arith.constant dense<0.000000e+00> : vector<8x288xf32>
      %77 = tpu.matmul %76, %74, %cst_46 {dimension_numbers = #tpu.dot_dimension_numbers<[1], [0], [0], [1], [0, 0, 1, 1], [], []>} : vector<8x4xbf16>, vector<4x288xbf16>, vector<8x288xf32> -> vector<8x288xf32>
      %78 = arith.addf %73, %77 : vector<8x288xf32>
      %79 = vector.extract_strided_slice %78 {offsets = [0, 0], sizes = [8, 16], strides = [1, 1]} : vector<8x288xf32> to vector<8x16xf32>
      %80 = vector.extract_strided_slice %78 {offsets = [0, 18], sizes = [8, 16], strides = [1, 1]} : vector<8x288xf32> to vector<8x16xf32>
      %81 = vector.extract_strided_slice %78 {offsets = [0, 36], sizes = [8, 16], strides = [1, 1]} : vector<8x288xf32> to vector<8x16xf32>
      %82 = vector.extract_strided_slice %78 {offsets = [0, 54], sizes = [8, 16], strides = [1, 1]} : vector<8x288xf32> to vector<8x16xf32>
      %83 = vector.extract_strided_slice %78 {offsets = [0, 72], sizes = [8, 16], strides = [1, 1]} : vector<8x288xf32> to vector<8x16xf32>
      %84 = vector.extract_strided_slice %78 {offsets = [0, 90], sizes = [8, 16], strides = [1, 1]} : vector<8x288xf32> to vector<8x16xf32>
      %85 = vector.extract_strided_slice %78 {offsets = [0, 108], sizes = [8, 16], strides = [1, 1]} : vector<8x288xf32> to vector<8x16xf32>
      %86 = vector.extract_strided_slice %78 {offsets = [0, 126], sizes = [8, 16], strides = [1, 1]} : vector<8x288xf32> to vector<8x16xf32>
      %87 = vector.extract_strided_slice %78 {offsets = [0, 144], sizes = [8, 16], strides = [1, 1]} : vector<8x288xf32> to vector<8x16xf32>
      %88 = vector.extract_strided_slice %78 {offsets = [0, 162], sizes = [8, 16], strides = [1, 1]} : vector<8x288xf32> to vector<8x16xf32>
      %89 = vector.extract_strided_slice %78 {offsets = [0, 180], sizes = [8, 16], strides = [1, 1]} : vector<8x288xf32> to vector<8x16xf32>
      %90 = vector.extract_strided_slice %78 {offsets = [0, 198], sizes = [8, 16], strides = [1, 1]} : vector<8x288xf32> to vector<8x16xf32>
      %91 = vector.extract_strided_slice %78 {offsets = [0, 216], sizes = [8, 16], strides = [1, 1]} : vector<8x288xf32> to vector<8x16xf32>
      %92 = vector.extract_strided_slice %78 {offsets = [0, 234], sizes = [8, 16], strides = [1, 1]} : vector<8x288xf32> to vector<8x16xf32>
      %93 = vector.extract_strided_slice %78 {offsets = [0, 252], sizes = [8, 16], strides = [1, 1]} : vector<8x288xf32> to vector<8x16xf32>
      %94 = vector.extract_strided_slice %78 {offsets = [0, 270], sizes = [8, 16], strides = [1, 1]} : vector<8x288xf32> to vector<8x16xf32>
      %95 = tpu.concatenate %79, %80, %81, %82, %83, %84, %85, %86, %87, %88, %89, %90, %91, %92, %93, %94 in 1 : vector<8x16xf32>, vector<8x16xf32>, vector<8x16xf32>, vector<8x16xf32>, vector<8x16xf32>, vector<8x16xf32>, vector<8x16xf32>, vector<8x16xf32>, vector<8x16xf32>, vector<8x16xf32>, vector<8x16xf32>, vector<8x16xf32>, vector<8x16xf32>, vector<8x16xf32>, vector<8x16xf32>, vector<8x16xf32> -> vector<8x256xf32>
      %96 = arith.index_cast %30 : i32 to index
      %c0_47 = arith.constant 0 : index
      %c0_48 = arith.constant 0 : index
      %97 = vector.load %arg7[%96, %c0_47, %c0_48] : memref<2x8x256xf32, #tpu.memory_space<vmem>>, vector<1x8x256xf32>
      %98 = vector.shape_cast %97 : vector<1x8x256xf32> to vector<8x256xf32>
      %99 = vector.shape_cast %95 : vector<8x256xf32> to vector<1x8x256xf32>
      tpu.vector_store %arg7[%96, %c0_47, %c0_48], %99 {strides = array<i32>} : memref<2x8x256xf32, #tpu.memory_space<vmem>>, vector<1x8x256xf32>,
      %c0_49 = arith.constant 0 : index
      %c0_50 = arith.constant 0 : index
      %100 = vector.load %arg8[%c0_49, %c0_50] : memref<8x1xf32, #tpu.memory_space<vmem>>, vector<8x1xf32>
      %cst_51 = arith.constant dense<0.000000e+00> : vector<8xf32>
      %101 = vector.multi_reduction <add>, %95, %cst_51 [1] : vector<8x256xf32> to vector<8xf32>
      %102 = vector.shape_cast %101 : vector<8xf32> to vector<8x1xf32>
      %103 = arith.addf %100, %102 : vector<8x1xf32>
      %c0_52 = arith.constant 0 : index
      %c0_53 = arith.constant 0 : index
      %104 = vector.load %arg8[%c0_52, %c0_53] : memref<8x1xf32, #tpu.memory_space<vmem>>, vector<8x1xf32>
      tpu.vector_store %arg8[%c0_52, %c0_53], %103 {strides = array<i32>} : memref<8x1xf32, #tpu.memory_space<vmem>>, vector<8x1xf32>,
      %c2_i32_54 = arith.constant 2 : i32
      %105 = arith.muli %arg1, %c2_i32_54 : i32
      %c1_i32_55 = arith.constant 1 : i32
      %106 = arith.addi %105, %c1_i32_55 : i32
      %c1_56 = arith.constant 1 : index
      %c0_57 = arith.constant 0 : index
      %c0_58 = arith.constant 0 : index
      %107 = vector.load %arg2[%c1_56, %c0_57, %c0_58] : memref<2x4x326xbf16, #tpu.memory_space<vmem>>, vector<1x4x326xbf16>
      %108 = vector.shape_cast %107 : vector<1x4x326xbf16> to vector<4x326xbf16>
      %cst_59 = arith.constant 0.000000e+00 : f32
      %109 = vector.broadcast %cst_59 : f32 to vector<8x288xf32>
      %110 = vector.extract_strided_slice %108 {offsets = [0, 0], sizes = [4, 288], strides = [1, 1]} : vector<4x326xbf16> to vector<4x288xbf16>
      %c0_60 = arith.constant 0 : index
      %c0_61 = arith.constant 0 : index
      %c0_62 = arith.constant 0 : index
      %111 = vector.load %arg3[%c0_60, %c0_61, %c0_62] : memref<9x8x4xbf16, #tpu.memory_space<vmem>>, vector<1x8x4xbf16>
      %112 = vector.shape_cast %111 : vector<1x8x4xbf16> to vector<8x4xbf16>
      %cst_63 = arith.constant dense<0.000000e+00> : vector<8x288xf32>
      %113 = tpu.matmul %112, %110, %cst_63 {dimension_numbers = #tpu.dot_dimension_numbers<[1], [0], [0], [1], [0, 0, 1, 1], [], []>} : vector<8x4xbf16>, vector<4x288xbf16>, vector<8x288xf32> -> vector<8x288xf32>
      %114 = arith.addf %109, %113 : vector<8x288xf32>
      %115 = vector.extract_strided_slice %108 {offsets = [0, 1], sizes = [4, 288], strides = [1, 1]} : vector<4x326xbf16> to vector<4x288xbf16>
      %c1_64 = arith.constant 1 : index
      %c0_65 = arith.constant 0 : index
      %c0_66 = arith.constant 0 : index
      %116 = vector.load %arg3[%c1_64, %c0_65, %c0_66] : memref<9x8x4xbf16, #tpu.memory_space<vmem>>, vector<1x8x4xbf16>
      %117 = vector.shape_cast %116 : vector<1x8x4xbf16> to vector<8x4xbf16>
      %cst_67 = arith.constant dense<0.000000e+00> : vector<8x288xf32>
      %118 = tpu.matmul %117, %115, %cst_67 {dimension_numbers = #tpu.dot_dimension_numbers<[1], [0], [0], [1], [0, 0, 1, 1], [], []>} : vector<8x4xbf16>, vector<4x288xbf16>, vector<8x288xf32> -> vector<8x288xf32>
      %119 = arith.addf %114, %118 : vector<8x288xf32>
      %120 = vector.extract_strided_slice %108 {offsets = [0, 2], sizes = [4, 288], strides = [1, 1]} : vector<4x326xbf16> to vector<4x288xbf16>
      %c2_68 = arith.constant 2 : index
      %c0_69 = arith.constant 0 : index
      %c0_70 = arith.constant 0 : index
      %121 = vector.load %arg3[%c2_68, %c0_69, %c0_70] : memref<9x8x4xbf16, #tpu.memory_space<vmem>>, vector<1x8x4xbf16>
      %122 = vector.shape_cast %121 : vector<1x8x4xbf16> to vector<8x4xbf16>
      %cst_71 = arith.constant dense<0.000000e+00> : vector<8x288xf32>
      %123 = tpu.matmul %122, %120, %cst_71 {dimension_numbers = #tpu.dot_dimension_numbers<[1], [0], [0], [1], [0, 0, 1, 1], [], []>} : vector<8x4xbf16>, vector<4x288xbf16>, vector<8x288xf32> -> vector<8x288xf32>
      %124 = arith.addf %119, %123 : vector<8x288xf32>
      %125 = vector.extract_strided_slice %108 {offsets = [0, 18], sizes = [4, 288], strides = [1, 1]} : vector<4x326xbf16> to vector<4x288xbf16>
      %c3_72 = arith.constant 3 : index
      %c0_73 = arith.constant 0 : index
      %c0_74 = arith.constant 0 : index
      %126 = vector.load %arg3[%c3_72, %c0_73, %c0_74] : memref<9x8x4xbf16, #tpu.memory_space<vmem>>, vector<1x8x4xbf16>
      %127 = vector.shape_cast %126 : vector<1x8x4xbf16> to vector<8x4xbf16>
      %cst_75 = arith.constant dense<0.000000e+00> : vector<8x288xf32>
      %128 = tpu.matmul %127, %125, %cst_75 {dimension_numbers = #tpu.dot_dimension_numbers<[1], [0], [0], [1], [0, 0, 1, 1], [], []>} : vector<8x4xbf16>, vector<4x288xbf16>, vector<8x288xf32> -> vector<8x288xf32>
      %129 = arith.addf %124, %128 : vector<8x288xf32>
      %130 = vector.extract_strided_slice %108 {offsets = [0, 19], sizes = [4, 288], strides = [1, 1]} : vector<4x326xbf16> to vector<4x288xbf16>
      %c4_76 = arith.constant 4 : index
      %c0_77 = arith.constant 0 : index
      %c0_78 = arith.constant 0 : index
      %131 = vector.load %arg3[%c4_76, %c0_77, %c0_78] : memref<9x8x4xbf16, #tpu.memory_space<vmem>>, vector<1x8x4xbf16>
      %132 = vector.shape_cast %131 : vector<1x8x4xbf16> to vector<8x4xbf16>
      %cst_79 = arith.constant dense<0.000000e+00> : vector<8x288xf32>
      %133 = tpu.matmul %132, %130, %cst_79 {dimension_numbers = #tpu.dot_dimension_numbers<[1], [0], [0], [1], [0, 0, 1, 1], [], []>} : vector<8x4xbf16>, vector<4x288xbf16>, vector<8x288xf32> -> vector<8x288xf32>
      %134 = arith.addf %129, %133 : vector<8x288xf32>
      %135 = vector.extract_strided_slice %108 {offsets = [0, 20], sizes = [4, 288], strides = [1, 1]} : vector<4x326xbf16> to vector<4x288xbf16>
      %c5_80 = arith.constant 5 : index
      %c0_81 = arith.constant 0 : index
      %c0_82 = arith.constant 0 : index
      %136 = vector.load %arg3[%c5_80, %c0_81, %c0_82] : memref<9x8x4xbf16, #tpu.memory_space<vmem>>, vector<1x8x4xbf16>
      %137 = vector.shape_cast %136 : vector<1x8x4xbf16> to vector<8x4xbf16>
      %cst_83 = arith.constant dense<0.000000e+00> : vector<8x288xf32>
      %138 = tpu.matmul %137, %135, %cst_83 {dimension_numbers = #tpu.dot_dimension_numbers<[1], [0], [0], [1], [0, 0, 1, 1], [], []>} : vector<8x4xbf16>, vector<4x288xbf16>, vector<8x288xf32> -> vector<8x288xf32>
      %139 = arith.addf %134, %138 : vector<8x288xf32>
      %140 = vector.extract_strided_slice %108 {offsets = [0, 36], sizes = [4, 288], strides = [1, 1]} : vector<4x326xbf16> to vector<4x288xbf16>
      %c6_84 = arith.constant 6 : index
      %c0_85 = arith.constant 0 : index
      %c0_86 = arith.constant 0 : index
      %141 = vector.load %arg3[%c6_84, %c0_85, %c0_86] : memref<9x8x4xbf16, #tpu.memory_space<vmem>>, vector<1x8x4xbf16>
      %142 = vector.shape_cast %141 : vector<1x8x4xbf16> to vector<8x4xbf16>
      %cst_87 = arith.constant dense<0.000000e+00> : vector<8x288xf32>
      %143 = tpu.matmul %142, %140, %cst_87 {dimension_numbers = #tpu.dot_dimension_numbers<[1], [0], [0], [1], [0, 0, 1, 1], [], []>} : vector<8x4xbf16>, vector<4x288xbf16>, vector<8x288xf32> -> vector<8x288xf32>
      %144 = arith.addf %139, %143 : vector<8x288xf32>
      %145 = vector.extract_strided_slice %108 {offsets = [0, 37], sizes = [4, 288], strides = [1, 1]} : vector<4x326xbf16> to vector<4x288xbf16>
      %c7_88 = arith.constant 7 : index
      %c0_89 = arith.constant 0 : index
      %c0_90 = arith.constant 0 : index
      %146 = vector.load %arg3[%c7_88, %c0_89, %c0_90] : memref<9x8x4xbf16, #tpu.memory_space<vmem>>, vector<1x8x4xbf16>
      %147 = vector.shape_cast %146 : vector<1x8x4xbf16> to vector<8x4xbf16>
      %cst_91 = arith.constant dense<0.000000e+00> : vector<8x288xf32>
      %148 = tpu.matmul %147, %145, %cst_91 {dimension_numbers = #tpu.dot_dimension_numbers<[1], [0], [0], [1], [0, 0, 1, 1], [], []>} : vector<8x4xbf16>, vector<4x288xbf16>, vector<8x288xf32> -> vector<8x288xf32>
      %149 = arith.addf %144, %148 : vector<8x288xf32>
      %150 = vector.extract_strided_slice %108 {offsets = [0, 38], sizes = [4, 288], strides = [1, 1]} : vector<4x326xbf16> to vector<4x288xbf16>
      %c8_92 = arith.constant 8 : index
      %c0_93 = arith.constant 0 : index
      %c0_94 = arith.constant 0 : index
      %151 = vector.load %arg3[%c8_92, %c0_93, %c0_94] : memref<9x8x4xbf16, #tpu.memory_space<vmem>>, vector<1x8x4xbf16>
      %152 = vector.shape_cast %151 : vector<1x8x4xbf16> to vector<8x4xbf16>
      %cst_95 = arith.constant dense<0.000000e+00> : vector<8x288xf32>
      %153 = tpu.matmul %152, %150, %cst_95 {dimension_numbers = #tpu.dot_dimension_numbers<[1], [0], [0], [1], [0, 0, 1, 1], [], []>} : vector<8x4xbf16>, vector<4x288xbf16>, vector<8x288xf32> -> vector<8x288xf32>
      %154 = arith.addf %149, %153 : vector<8x288xf32>
      %155 = vector.extract_strided_slice %154 {offsets = [0, 0], sizes = [8, 16], strides = [1, 1]} : vector<8x288xf32> to vector<8x16xf32>
      %156 = vector.extract_strided_slice %154 {offsets = [0, 18], sizes = [8, 16], strides = [1, 1]} : vector<8x288xf32> to vector<8x16xf32>
      %157 = vector.extract_strided_slice %154 {offsets = [0, 36], sizes = [8, 16], strides = [1, 1]} : vector<8x288xf32> to vector<8x16xf32>
      %158 = vector.extract_strided_slice %154 {offsets = [0, 54], sizes = [8, 16], strides = [1, 1]} : vector<8x288xf32> to vector<8x16xf32>
      %159 = vector.extract_strided_slice %154 {offsets = [0, 72], sizes = [8, 16], strides = [1, 1]} : vector<8x288xf32> to vector<8x16xf32>
      %160 = vector.extract_strided_slice %154 {offsets = [0, 90], sizes = [8, 16], strides = [1, 1]} : vector<8x288xf32> to vector<8x16xf32>
      %161 = vector.extract_strided_slice %154 {offsets = [0, 108], sizes = [8, 16], strides = [1, 1]} : vector<8x288xf32> to vector<8x16xf32>
      %162 = vector.extract_strided_slice %154 {offsets = [0, 126], sizes = [8, 16], strides = [1, 1]} : vector<8x288xf32> to vector<8x16xf32>
      %163 = vector.extract_strided_slice %154 {offsets = [0, 144], sizes = [8, 16], strides = [1, 1]} : vector<8x288xf32> to vector<8x16xf32>
      %164 = vector.extract_strided_slice %154 {offsets = [0, 162], sizes = [8, 16], strides = [1, 1]} : vector<8x288xf32> to vector<8x16xf32>
      %165 = vector.extract_strided_slice %154 {offsets = [0, 180], sizes = [8, 16], strides = [1, 1]} : vector<8x288xf32> to vector<8x16xf32>
      %166 = vector.extract_strided_slice %154 {offsets = [0, 198], sizes = [8, 16], strides = [1, 1]} : vector<8x288xf32> to vector<8x16xf32>
      %167 = vector.extract_strided_slice %154 {offsets = [0, 216], sizes = [8, 16], strides = [1, 1]} : vector<8x288xf32> to vector<8x16xf32>
      %168 = vector.extract_strided_slice %154 {offsets = [0, 234], sizes = [8, 16], strides = [1, 1]} : vector<8x288xf32> to vector<8x16xf32>
      %169 = vector.extract_strided_slice %154 {offsets = [0, 252], sizes = [8, 16], strides = [1, 1]} : vector<8x288xf32> to vector<8x16xf32>
      %170 = vector.extract_strided_slice %154 {offsets = [0, 270], sizes = [8, 16], strides = [1, 1]} : vector<8x288xf32> to vector<8x16xf32>
      %171 = tpu.concatenate %155, %156, %157, %158, %159, %160, %161, %162, %163, %164, %165, %166, %167, %168, %169, %170 in 1 : vector<8x16xf32>, vector<8x16xf32>, vector<8x16xf32>, vector<8x16xf32>, vector<8x16xf32>, vector<8x16xf32>, vector<8x16xf32>, vector<8x16xf32>, vector<8x16xf32>, vector<8x16xf32>, vector<8x16xf32>, vector<8x16xf32>, vector<8x16xf32>, vector<8x16xf32>, vector<8x16xf32>, vector<8x16xf32> -> vector<8x256xf32>
      %172 = arith.index_cast %106 : i32 to index
      %c0_96 = arith.constant 0 : index
      %c0_97 = arith.constant 0 : index
      %173 = vector.load %arg7[%172, %c0_96, %c0_97] : memref<2x8x256xf32, #tpu.memory_space<vmem>>, vector<1x8x256xf32>
      %174 = vector.shape_cast %173 : vector<1x8x256xf32> to vector<8x256xf32>
      %175 = vector.shape_cast %171 : vector<8x256xf32> to vector<1x8x256xf32>
      tpu.vector_store %arg7[%172, %c0_96, %c0_97], %175 {strides = array<i32>} : memref<2x8x256xf32, #tpu.memory_space<vmem>>, vector<1x8x256xf32>,
      %c0_98 = arith.constant 0 : index
      %c0_99 = arith.constant 0 : index
      %176 = vector.load %arg8[%c0_98, %c0_99] : memref<8x1xf32, #tpu.memory_space<vmem>>, vector<8x1xf32>
      %cst_100 = arith.constant dense<0.000000e+00> : vector<8xf32>
      %177 = vector.multi_reduction <add>, %171, %cst_100 [1] : vector<8x256xf32> to vector<8xf32>
      %178 = vector.shape_cast %177 : vector<8xf32> to vector<8x1xf32>
      %179 = arith.addf %176, %178 : vector<8x1xf32>
      %c0_101 = arith.constant 0 : index
      %c0_102 = arith.constant 0 : index
      %180 = vector.load %arg8[%c0_101, %c0_102] : memref<8x1xf32, #tpu.memory_space<vmem>>, vector<8x1xf32>
      tpu.vector_store %arg8[%c0_101, %c0_102], %179 {strides = array<i32>} : memref<8x1xf32, #tpu.memory_space<vmem>>, vector<8x1xf32>,
    } else {
    }
    %c0_i32_4 = arith.constant 0 : i32
    %8 = arith.cmpi eq, %arg0, %c0_i32_4 : i32
    %c0_i32_5 = arith.constant 0 : i32
    %9 = arith.cmpi eq, %arg1, %c0_i32_5 : i32
    %10 = arith.andi %8, %9 : i1
    %11 = arith.extui %10 : i1 to i32
    %c0_i32_6 = arith.constant 0 : i32
    %12 = arith.cmpi ne, %11, %c0_i32_6 : i32
    scf.if %12 {
      %c0 = arith.constant 0 : index
      %c0_15 = arith.constant 0 : index
      %29 = vector.load %arg8[%c0, %c0_15] : memref<8x1xf32, #tpu.memory_space<vmem>>, vector<8x1xf32>
      %cst = arith.constant 0.001953125 : f32
      %30 = vector.broadcast %cst : f32 to vector<8x1xf32>
      %31 = arith.mulf %29, %30 : vector<8x1xf32>
      %c0_16 = arith.constant 0 : index
      %c0_17 = arith.constant 0 : index
      %32 = vector.load %arg10[%c0_16, %c0_17] : memref<8x1xf32, #tpu.memory_space<vmem>>, vector<8x1xf32>
      tpu.vector_store %arg10[%c0_16, %c0_17], %31 {strides = array<i32>} : memref<8x1xf32, #tpu.memory_space<vmem>>, vector<8x1xf32>,
    } else {
    }
    %c1_i32 = arith.constant 1 : i32
    %13 = arith.cmpi eq, %arg0, %c1_i32 : i32
    %c0_i32_7 = arith.constant 0 : i32
    %14 = arith.cmpi eq, %arg1, %c0_i32_7 : i32
    %15 = arith.andi %13, %14 : i1
    %16 = arith.extui %15 : i1 to i32
    %c0_i32_8 = arith.constant 0 : i32
    %17 = arith.cmpi ne, %16, %c0_i32_8 : i32
    scf.if %17 {
      %cst = arith.constant 0.000000e+00 : f32
      %29 = vector.broadcast %cst : f32 to vector<8x1xf32>
      %c0 = arith.constant 0 : index
      %c0_15 = arith.constant 0 : index
      %30 = vector.load %arg9[%c0, %c0_15] : memref<8x1xf32, #tpu.memory_space<vmem>>, vector<8x1xf32>
      tpu.vector_store %arg9[%c0, %c0_15], %29 {strides = array<i32>} : memref<8x1xf32, #tpu.memory_space<vmem>>, vector<8x1xf32>,
    } else {
    }
    %c1_i32_9 = arith.constant 1 : i32
    %18 = arith.cmpi eq, %arg0, %c1_i32_9 : i32
    %19 = arith.extui %18 : i1 to i32
    %c0_i32_10 = arith.constant 0 : i32
    %20 = arith.cmpi ne, %19, %c0_i32_10 : i32
    scf.if %20 {
      %c2_i32_15 = arith.constant 2 : i32
      %29 = arith.muli %arg1, %c2_i32_15 : i32
      %c0_i32_16 = arith.constant 0 : i32
      %30 = arith.addi %29, %c0_i32_16 : i32
      %31 = arith.index_cast %30 : i32 to index
      %c0 = arith.constant 0 : index
      %c0_17 = arith.constant 0 : index
      %32 = vector.load %arg7[%31, %c0, %c0_17] : memref<2x8x256xf32, #tpu.memory_space<vmem>>, vector<1x8x256xf32>
      %33 = vector.shape_cast %32 : vector<1x8x256xf32> to vector<8x256xf32>
      %c0_18 = arith.constant 0 : index
      %c0_19 = arith.constant 0 : index
      %34 = vector.load %arg10[%c0_18, %c0_19] : memref<8x1xf32, #tpu.memory_space<vmem>>, vector<8x1xf32>
      %35 = vector.broadcast %34 : vector<8x1xf32> to vector<8x256xf32>
      %36 = arith.subf %33, %35 : vector<8x256xf32>
      %c0_20 = arith.constant 0 : index
      %c0_21 = arith.constant 0 : index
      %37 = vector.load %arg9[%c0_20, %c0_21] : memref<8x1xf32, #tpu.memory_space<vmem>>, vector<8x1xf32>
      %38 = arith.mulf %36, %36 : vector<8x256xf32>
      %cst = arith.constant dense<0.000000e+00> : vector<8xf32>
      %39 = vector.multi_reduction <add>, %38, %cst [1] : vector<8x256xf32> to vector<8xf32>
      %40 = vector.shape_cast %39 : vector<8xf32> to vector<8x1xf32>
      %41 = arith.addf %37, %40 : vector<8x1xf32>
      %c0_22 = arith.constant 0 : index
      %c0_23 = arith.constant 0 : index
      %42 = vector.load %arg9[%c0_22, %c0_23] : memref<8x1xf32, #tpu.memory_space<vmem>>, vector<8x1xf32>
      tpu.vector_store %arg9[%c0_22, %c0_23], %41 {strides = array<i32>} : memref<8x1xf32, #tpu.memory_space<vmem>>, vector<8x1xf32>,
      %c2_i32_24 = arith.constant 2 : i32
      %43 = arith.muli %arg1, %c2_i32_24 : i32
      %c1_i32_25 = arith.constant 1 : i32
      %44 = arith.addi %43, %c1_i32_25 : i32
      %45 = arith.index_cast %44 : i32 to index
      %c0_26 = arith.constant 0 : index
      %c0_27 = arith.constant 0 : index
      %46 = vector.load %arg7[%45, %c0_26, %c0_27] : memref<2x8x256xf32, #tpu.memory_space<vmem>>, vector<1x8x256xf32>
      %47 = vector.shape_cast %46 : vector<1x8x256xf32> to vector<8x256xf32>
      %c0_28 = arith.constant 0 : index
      %c0_29 = arith.constant 0 : index
      %48 = vector.load %arg10[%c0_28, %c0_29] : memref<8x1xf32, #tpu.memory_space<vmem>>, vector<8x1xf32>
      %49 = vector.broadcast %48 : vector<8x1xf32> to vector<8x256xf32>
      %50 = arith.subf %47, %49 : vector<8x256xf32>
      %c0_30 = arith.constant 0 : index
      %c0_31 = arith.constant 0 : index
      %51 = vector.load %arg9[%c0_30, %c0_31] : memref<8x1xf32, #tpu.memory_space<vmem>>, vector<8x1xf32>
      %52 = arith.mulf %50, %50 : vector<8x256xf32>
      %cst_32 = arith.constant dense<0.000000e+00> : vector<8xf32>
      %53 = vector.multi_reduction <add>, %52, %cst_32 [1] : vector<8x256xf32> to vector<8xf32>
      %54 = vector.shape_cast %53 : vector<8xf32> to vector<8x1xf32>
      %55 = arith.addf %51, %54 : vector<8x1xf32>
      %c0_33 = arith.constant 0 : index
      %c0_34 = arith.constant 0 : index
      %56 = vector.load %arg9[%c0_33, %c0_34] : memref<8x1xf32, #tpu.memory_space<vmem>>, vector<8x1xf32>
      tpu.vector_store %arg9[%c0_33, %c0_34], %55 {strides = array<i32>} : memref<8x1xf32, #tpu.memory_space<vmem>>, vector<8x1xf32>,
    } else {
    }
    %c1_i32_11 = arith.constant 1 : i32
    %21 = arith.cmpi eq, %arg0, %c1_i32_11 : i32
    %c0_i32_12 = arith.constant 0 : i32
    %22 = arith.cmpi eq, %arg1, %c0_i32_12 : i32
    %23 = arith.andi %21, %22 : i1
    %24 = arith.extui %23 : i1 to i32
    %c0_i32_13 = arith.constant 0 : i32
    %25 = arith.cmpi ne, %24, %c0_i32_13 : i32
    scf.if %25 {
      %c0 = arith.constant 0 : index
      %c0_15 = arith.constant 0 : index
      %29 = vector.load %arg9[%c0, %c0_15] : memref<8x1xf32, #tpu.memory_space<vmem>>, vector<8x1xf32>
      %cst = arith.constant 0.001953125 : f32
      %30 = vector.broadcast %cst : f32 to vector<8x1xf32>
      %31 = arith.mulf %29, %30 : vector<8x1xf32>
      %cst_16 = arith.constant 9.99999974E-6 : f32
      %32 = vector.broadcast %cst_16 : f32 to vector<8x1xf32>
      %33 = arith.addf %31, %32 : vector<8x1xf32>
      %34 = math.rsqrt %33 : vector<8x1xf32>
      %c0_17 = arith.constant 0 : index
      %c0_18 = arith.constant 0 : index
      %35 = vector.load %arg4[%c0_17, %c0_18] : memref<8x1xf32, #tpu.memory_space<vmem>>, vector<8x1xf32>
      %36 = arith.mulf %35, %34 : vector<8x1xf32>
      %c0_19 = arith.constant 0 : index
      %c0_20 = arith.constant 0 : index
      %37 = vector.load %arg11[%c0_19, %c0_20] : memref<8x1xf32, #tpu.memory_space<vmem>>, vector<8x1xf32>
      tpu.vector_store %arg11[%c0_19, %c0_20], %36 {strides = array<i32>} : memref<8x1xf32, #tpu.memory_space<vmem>>, vector<8x1xf32>,
      %c0_21 = arith.constant 0 : index
      %c0_22 = arith.constant 0 : index
      %38 = vector.load %arg5[%c0_21, %c0_22] : memref<8x1xf32, #tpu.memory_space<vmem>>, vector<8x1xf32>
      %c0_23 = arith.constant 0 : index
      %c0_24 = arith.constant 0 : index
      %39 = vector.load %arg10[%c0_23, %c0_24] : memref<8x1xf32, #tpu.memory_space<vmem>>, vector<8x1xf32>
      %40 = arith.mulf %39, %36 : vector<8x1xf32>
      %41 = arith.subf %38, %40 : vector<8x1xf32>
      %c0_25 = arith.constant 0 : index
      %c0_26 = arith.constant 0 : index
      %42 = vector.load %arg12[%c0_25, %c0_26] : memref<8x1xf32, #tpu.memory_space<vmem>>, vector<8x1xf32>
      tpu.vector_store %arg12[%c0_25, %c0_26], %41 {strides = array<i32>} : memref<8x1xf32, #tpu.memory_space<vmem>>, vector<8x1xf32>,
    } else {
    }
    %c2_i32 = arith.constant 2 : i32
    %26 = arith.cmpi eq, %arg0, %c2_i32 : i32
    %27 = arith.extui %26 : i1 to i32
    %c0_i32_14 = arith.constant 0 : i32
    %28 = arith.cmpi ne, %27, %c0_i32_14 : i32
    scf.if %28 {
      %c2_i32_15 = arith.constant 2 : i32
      %29 = arith.muli %arg1, %c2_i32_15 : i32
      %c0_i32_16 = arith.constant 0 : i32
      %30 = arith.addi %29, %c0_i32_16 : i32
      %31 = arith.index_cast %30 : i32 to index
      %c0 = arith.constant 0 : index
      %c0_17 = arith.constant 0 : index
      %32 = vector.load %arg7[%31, %c0, %c0_17] : memref<2x8x256xf32, #tpu.memory_space<vmem>>, vector<1x8x256xf32>
      %33 = vector.shape_cast %32 : vector<1x8x256xf32> to vector<8x256xf32>
      %c0_18 = arith.constant 0 : index
      %c0_19 = arith.constant 0 : index
      %34 = vector.load %arg11[%c0_18, %c0_19] : memref<8x1xf32, #tpu.memory_space<vmem>>, vector<8x1xf32>
      %35 = vector.broadcast %34 : vector<8x1xf32> to vector<8x256xf32>
      %36 = arith.mulf %33, %35 : vector<8x256xf32>
      %c0_20 = arith.constant 0 : index
      %c0_21 = arith.constant 0 : index
      %37 = vector.load %arg12[%c0_20, %c0_21] : memref<8x1xf32, #tpu.memory_space<vmem>>, vector<8x1xf32>
      %38 = vector.broadcast %37 : vector<8x1xf32> to vector<8x256xf32>
      %39 = arith.addf %36, %38 : vector<8x256xf32>
      %cst = arith.constant 0.000000e+00 : f32
      %40 = vector.broadcast %cst : f32 to vector<8x256xf32>
      %41 = arith.cmpf oge, %39, %40 : vector<8x256xf32>
      %cst_22 = arith.constant 2.000000e-01 : f32
      %42 = vector.broadcast %cst_22 : f32 to vector<8x256xf32>
      %43 = arith.mulf %42, %39 : vector<8x256xf32>
      %44 = arith.select %41, %39, %43 : vector<8x256xi1>, vector<8x256xf32>
      %c0_23 = arith.constant 0 : index
      %c0_24 = arith.constant 0 : index
      %c0_25 = arith.constant 0 : index
      %45 = vector.load %arg6[%c0_23, %c0_24, %c0_25] : memref<2x8x256xf32, #tpu.memory_space<vmem>>, vector<1x8x256xf32>
      %46 = vector.shape_cast %45 : vector<1x8x256xf32> to vector<8x256xf32>
      %47 = vector.shape_cast %44 : vector<8x256xf32> to vector<1x8x256xf32>
      tpu.vector_store %arg6[%c0_23, %c0_24, %c0_25], %47 {strides = array<i32>} : memref<2x8x256xf32, #tpu.memory_space<vmem>>, vector<1x8x256xf32>,
      %c2_i32_26 = arith.constant 2 : i32
      %48 = arith.muli %arg1, %c2_i32_26 : i32
      %c1_i32_27 = arith.constant 1 : i32
      %49 = arith.addi %48, %c1_i32_27 : i32
      %50 = arith.index_cast %49 : i32 to index
      %c0_28 = arith.constant 0 : index
      %c0_29 = arith.constant 0 : index
      %51 = vector.load %arg7[%50, %c0_28, %c0_29] : memref<2x8x256xf32, #tpu.memory_space<vmem>>, vector<1x8x256xf32>
      %52 = vector.shape_cast %51 : vector<1x8x256xf32> to vector<8x256xf32>
      %c0_30 = arith.constant 0 : index
      %c0_31 = arith.constant 0 : index
      %53 = vector.load %arg11[%c0_30, %c0_31] : memref<8x1xf32, #tpu.memory_space<vmem>>, vector<8x1xf32>
      %54 = vector.broadcast %53 : vector<8x1xf32> to vector<8x256xf32>
      %55 = arith.mulf %52, %54 : vector<8x256xf32>
      %c0_32 = arith.constant 0 : index
      %c0_33 = arith.constant 0 : index
      %56 = vector.load %arg12[%c0_32, %c0_33] : memref<8x1xf32, #tpu.memory_space<vmem>>, vector<8x1xf32>
      %57 = vector.broadcast %56 : vector<8x1xf32> to vector<8x256xf32>
      %58 = arith.addf %55, %57 : vector<8x256xf32>
      %cst_34 = arith.constant 0.000000e+00 : f32
      %59 = vector.broadcast %cst_34 : f32 to vector<8x256xf32>
      %60 = arith.cmpf oge, %58, %59 : vector<8x256xf32>
      %cst_35 = arith.constant 2.000000e-01 : f32
      %61 = vector.broadcast %cst_35 : f32 to vector<8x256xf32>
      %62 = arith.mulf %61, %58 : vector<8x256xf32>
      %63 = arith.select %60, %58, %62 : vector<8x256xi1>, vector<8x256xf32>
      %c1 = arith.constant 1 : index
      %c0_36 = arith.constant 0 : index
      %c0_37 = arith.constant 0 : index
      %64 = vector.load %arg6[%c1, %c0_36, %c0_37] : memref<2x8x256xf32, #tpu.memory_space<vmem>>, vector<1x8x256xf32>
      %65 = vector.shape_cast %64 : vector<1x8x256xf32> to vector<8x256xf32>
      %66 = vector.shape_cast %63 : vector<8x256xf32> to vector<1x8x256xf32>
      tpu.vector_store %arg6[%c1, %c0_36, %c0_37], %66 {strides = array<i32>} : memref<2x8x256xf32, #tpu.memory_space<vmem>>, vector<1x8x256xf32>,
    } else {
    }
    return
  }
  func.func @transform_0(%arg0: i32, %arg1: i32) -> (i32, i32, i32) {
    %c0_i32 = arith.constant 0 : i32
    %0 = arith.cmpi eq, %arg0, %c0_i32 : i32
    %c0_i32_0 = arith.constant 0 : i32
    %1 = arith.select %0, %arg1, %c0_i32_0 : i32
    %c0_i32_1 = arith.constant 0 : i32
    %c0_i32_2 = arith.constant 0 : i32
    %c0_i32_3 = arith.constant 0 : i32
    return %1, %c0_i32_1, %c0_i32_2 : i32, i32, i32
  }
  func.func @transform_1(%arg0: i32, %arg1: i32) -> (i32, i32, i32) {
    %c0_i32 = arith.constant 0 : i32
    %c0_i32_0 = arith.constant 0 : i32
    %c0_i32_1 = arith.constant 0 : i32
    %c0_i32_2 = arith.constant 0 : i32
    return %c0_i32, %c0_i32_0, %c0_i32_1 : i32, i32, i32
  }
  func.func @transform_2(%arg0: i32, %arg1: i32) -> (i32, i32) {
    %c0_i32 = arith.constant 0 : i32
    %c0_i32_0 = arith.constant 0 : i32
    %c0_i32_1 = arith.constant 0 : i32
    return %c0_i32, %c0_i32_0 : i32, i32
  }
  func.func @transform_3(%arg0: i32, %arg1: i32) -> (i32, i32) {
    %c0_i32 = arith.constant 0 : i32
    %c0_i32_0 = arith.constant 0 : i32
    %c0_i32_1 = arith.constant 0 : i32
    return %c0_i32, %c0_i32_0 : i32, i32
  }
  func.func @transform_4(%arg0: i32, %arg1: i32) -> (i32, i32, i32) {
    %c2_i32 = arith.constant 2 : i32
    %0 = arith.cmpi eq, %arg0, %c2_i32 : i32
    %c0_i32 = arith.constant 0 : i32
    %1 = arith.select %0, %arg1, %c0_i32 : i32
    %c0_i32_0 = arith.constant 0 : i32
    %c0_i32_1 = arith.constant 0 : i32
    %c0_i32_2 = arith.constant 0 : i32
    return %1, %c0_i32_0, %c0_i32_1 : i32, i32, i32
  }
}

</mosaic_0001>

<bundles_post_ra>
// kernel: tpu_custom_call.1
= control target key start
LH: loop header
LB: loop body
LE: loop exit
PB: predicated region body
PF: predicated region fallthrough
CT: control target
= control target key end

     0   :  { %9 = vsyncpa [#allocation9], 0  ;;  %s2628_s0 = inlined_call_operand.vmem [shape: bf16[2,4,326], index: 0, kind: input, shape index: {}]   ;;  %s2629_s1 = inlined_call_operand.vmem [shape: bf16[9,8,4], index: 1, kind: input, shape index: {}]   ;;  %s2630_s2 = inlined_call_operand.vmem [shape: f32[8,1], index: 2, kind: input, shape index: {}]   ;;  %s2631_s3 = inlined_call_operand.vmem [shape: f32[8,1], index: 3, kind: input, shape index: {}]   ;;  %s2632_s4 = inlined_call_operand.hbm [shape: f32[2,8,256], index: 4, kind: output, shape index: {}]  }
   0x1   :  { %11 = vsyncpa [#allocation9 + $0x1], 0  ;;  %s2187_s15 = smov 0   ;;  %s2189_s16 = smov 0  }
   0x2   :  { %s2191_s17 = smov 0  }
   0x3 LB: > { %s1916_s18 = sadd.s32 4294967295, %s2133_s17   ;;  %s1917_s19 = sadd.s32 4294967294, %s2133_s17   ;;  %s2133_s17 = sphi %s2191_s17, %s17_s17   ;;  %s2129_s16 = sphi %s2189_s16, %s2634_s16   ;;  %s2125_s15 = sphi %s2187_s15, %s2633_s15  }
   0x4   : > { %s29_s20 = sadd.s32 1, %s2129_s16  ;;  %p1921_p0 = scmp.ge.s32.totalorder %s2133_s17, 1 }
   0x5   : > { %p31_p1 = scmp.ge.s32.totalorder %s29_s20, 3  ;;  %p191_p2 = scmp.lt.s32.totalorder %s2133_s17, 4 }
   0x7   : > { %s2636_s20 = smov (%p31_p1, %s29_s20), 0  ;;  %p192_p3 = pnand %p1921_p0, %p191_p2 }
   0x8   : > { %p235_p4 = scmp.eq.s32.totalorder (!%p192_p3), %s2125_s15, 0 }
   0x9   : > { %195 = sbr.rel (%p192_p3) target bundleno = 1220 (0x4c4), region = 36 }
   0xe   : > { %240 = sbr.rel (!%p235_p4) target bundleno = 19 (0x13), region = 40  ;;  %vm241_vm0 = vcmask (%p235_p4), 7168   ;;  %v2135_v0 = vmov (%p235_p4), 0.0  }
   0xf   : > { %242 = vst.msk [vmem:[#allocation3] sm:$0xff] (%p235_p4), %vm241_vm0, %v2135_v0 }
  0x13 PF: > { %p1923_p5 = scmp.ne.s32.totalorder %s2125_s15, 0 }
  0x14   : > { %s2136_s23 = smov (!%p1923_p5), 127   ;;  %s2137_s24 = smov (!%p1923_p5), 126  }
  0x15   : > { %245 = sbr.rel (%p1923_p5) target bundleno = 763 (0x2fb), region = 44  ;;  %s2138_s25 = smov (!%p1923_p5), 110  }
  0x16   : > { %s2139_s26 = smov (!%p1923_p5), 109   ;;  %s2140_s27 = smov (!%p1923_p5), 108  }
  0x17   : > { %s2141_s28 = smov (!%p1923_p5), 92   ;;  %s2142_s29 = smov (!%p1923_p5), 91  }
  0x18   : > { %s2143_s6 = smov (!%p1923_p5), 90   ;;  %s2144_s9 = smov (!%p1923_p5), 122  }
  0x19   : > { %s2145_s10 = smov (!%p1923_p5), 124   ;;  %s2146_s11 = smov (!%p1923_p5), 116  }
  0x1a   : > { %v247_v1 = vld [vmem:[%s2628_s0] sm:$0x3f]  ;;  %v2246_v26 = vld [vmem:[%s2628_s0 + $0x6] sm:$0x3f]  ;;  %vm272_vm1 = vcmask 1041408   ;;  %vm268_vm2 = vcmask 31744  }
  0x1b   : > { %252 = vst [vmem:[#allocation1] ss:$4 sm:$0xff] %v247_v1  ;;  %v2261_v34 = vld [vmem:[%s2629_s1] sm:$0xf]  ;;  %v1924_v48 = vld [vmem:[%s2629_s1 + $0x4] sm:$0xf] }
  0x1c   : > { %vm265_vm3 = vcmask 1039360   ;;  %vm388_vm4 = vcmask 1031168   ;;  %vm460_vm5 = vcmask 900096   ;;  %vm532_vm6 = vcmask 891904   ;;  %s2147_s12 = smov 118   ;;  %s2148_s13 = smov 120  }
  0x1d   : > { %vm604_vm7 = vcmask 883712   ;;  %vm676_vm8 = vcmask 752640   ;;  %vm748_vm9 = vcmask 744448   ;;  %vm820_vm10 = vcmask 736256   ;;  %s2149_s14 = smov 112   ;;  %s2150_s21 = smov 114  }
  0x1e   : > { %s2151_s22 = smov 106   ;;  %vm933_vm11 = vcmask 130048   ;;  %vm935_vm12 = vcmask 261120   ;;  %vm937_vm13 = vcmask 392192   ;;  %vm939_vm14 = vcmask 523264  }
  0x1f   : > { %vm941_vm15 = vcmask 654336   ;;  %vm901_vm0 = vcmask 932864  }
  0x22   : > { %v253_v2 = vld.sshfl [vmem:[#allocation1] sm:$0xff pattern:$0x73625140]  ;;  %v257_v3 = vld.sshfl [vmem:[#allocation1 + $0x10] sm:$0xff pattern:$0x73625140] }
  0x23   : > { %259 = vrot.lane.b32.xlu0 %v253_v2, %s2136_s23  ;;  %263 = vrot.lane.b32.xlu1 %v257_v3, %s2136_s23  ;;  %v255_v4 = vld.sshfl [vmem:[#allocation1 + $0x8] sm:$0xff pattern:$0x73625140] }
  0x24   : > { %321 = vst [vmem:[#allocation1] ss:$4 sm:$0xff] %v247_v1 }
  0x2b   : > { %261 = vrot.lane.b32.xlu0 %v255_v4, %s2136_s23  ;;  %v2219_v5 = vld.sshfl [vmem:[#allocation1] sm:$0xff pattern:$0x73625140]  ;;  %v2221_v6 = vld.sshfl [vmem:[#allocation1 + $0x8] sm:$0xff pattern:$0x73625140] }
  0x2c   : > { %v2223_v7 = vld.sshfl [vmem:[#allocation1 + $0x10] sm:$0xff pattern:$0x73625140]  ;;  %v328_v33 = vsel %vm272_vm1, %v2219_v5, 0  ;;  %v330_v56 = vsel %vm272_vm1, %v2221_v6, 0 }
  0x2d   : > { %375 = vst [vmem:[#allocation1] ss:$4 sm:$0xff] %v247_v1  ;;  %341 = vmatpush.bf16.msra.mxu3 %v328_v33  ;;  %v332_v57 = vsel %vm272_vm1, %v2223_v7, 0  ;;  %v1931_v7 = vld [vmem:[%s2629_s1 + $0x8] sm:$0xf] }
  0x30   : > { %1928 = vmatmul.msk.bf16.vlgmr.msra.gmra.mxu3 %vm268_vm2, %v2261_v34 }
  0x34   : > { %v378_v8 = vld.sshfl [vmem:[#allocation1 + $0x8] sm:$0xff pattern:$0x73625140]  ;;  %v376_v9 = vld.sshfl [vmem:[#allocation1] sm:$0xff pattern:$0x73625140] }
  0x35   : > { %384 = vrot.lane.b32.xlu1 %v378_v8, %s2137_s24  ;;  %v380_v10 = vld.sshfl [vmem:[#allocation1 + $0x10] sm:$0xff pattern:$0x73625140] }
  0x36   : > { %386 = vrot.lane.b32.xlu2 %v380_v10, %s2137_s24  ;;  %447 = vst [vmem:[#allocation1] ss:$4 sm:$0xff] %v247_v1 }
  0x3d   : > { %v450_v11 = vld.sshfl [vmem:[#allocation1 + $0x8] sm:$0xff pattern:$0x73625140]  ;;  %v452_v12 = vld.sshfl [vmem:[#allocation1 + $0x10] sm:$0xff pattern:$0x73625140] }
  0x3e   : > { %456 = vrot.lane.b32.xlu1 %v450_v11, %s2138_s25  ;;  %v448_v13 = vld.sshfl [vmem:[#allocation1] sm:$0xff pattern:$0x73625140]  ;;  %382 = vrot.lane.b32.xlu2 %v376_v9, %s2137_s24 }
  0x3f   : > { %454 = vrot.lane.b32.xlu0 %v448_v13, %s2138_s25  ;;  %519 = vst [vmem:[#allocation1] ss:$4 sm:$0xff] %v247_v1 }
  0x46   : > { %v522_v14 = vld.sshfl [vmem:[#allocation1 + $0x8] sm:$0xff pattern:$0x73625140]  ;;  %v524_v15 = vld.sshfl [vmem:[#allocation1 + $0x10] sm:$0xff pattern:$0x73625140]  ;;  %458 = vrot.lane.b32.xlu2 %v452_v12, %s2138_s25 }
  0x47   : > { %528 = vrot.lane.b32.xlu1 %v522_v14, %s2139_s26  ;;  %v520_v16 = vld.sshfl [vmem:[#allocation1] sm:$0xff pattern:$0x73625140] }
  0x48   : > { %526 = vrot.lane.b32.xlu0 %v520_v16, %s2139_s26  ;;  %591 = vst [vmem:[#allocation1] ss:$4 sm:$0xff] %v247_v1 }
  0x4e   : > { %530 = vrot.lane.b32.xlu2 %v524_v15, %s2139_s26 }
  0x4f   : > { %v594_v17 = vld.sshfl [vmem:[#allocation1 + $0x8] sm:$0xff pattern:$0x73625140]  ;;  %v596_v18 = vld.sshfl [vmem:[#allocation1 + $0x10] sm:$0xff pattern:$0x73625140] }
  0x50   : > { %600 = vrot.lane.b32.xlu1 %v594_v17, %s2140_s27  ;;  %v592_v19 = vld.sshfl [vmem:[#allocation1] sm:$0xff pattern:$0x73625140] }
  0x51   : > { %598 = vrot.lane.b32.xlu0 %v592_v19, %s2140_s27  ;;  %663 = vst [vmem:[#allocation1] ss:$4 sm:$0xff] %v247_v1 }
  0x56   : > { %602 = vrot.lane.b32.xlu2 %v596_v18, %s2140_s27 }
  0x58   : > { %v668_v20 = vld.sshfl [vmem:[#allocation1 + $0x10] sm:$0xff pattern:$0x73625140]  ;;  %v664_v21 = vld.sshfl [vmem:[#allocation1] sm:$0xff pattern:$0x73625140] }
  0x59   : > { %674 = vrot.lane.b32.xlu1 %v668_v20, %s2141_s28  ;;  %v666_v22 = vld.sshfl [vmem:[#allocation1 + $0x8] sm:$0xff pattern:$0x73625140] }
  0x5a   : > { %672 = vrot.lane.b32.xlu0 %v666_v22, %s2141_s28  ;;  %735 = vst [vmem:[#allocation1] ss:$4 sm:$0xff] %v247_v1  ;;  %v1935_v20 = vld [vmem:[%s2629_s1 + $0xc] sm:$0xf] }
  0x5e   : > { %670 = vrot.lane.b32.xlu2 %v664_v21, %s2141_s28 }
  0x61   : > { %v738_v23 = vld.sshfl [vmem:[#allocation1 + $0x8] sm:$0xff pattern:$0x73625140]  ;;  %v740_v24 = vld.sshfl [vmem:[#allocation1 + $0x10] sm:$0xff pattern:$0x73625140] }
  0x62   : > { %744 = vrot.lane.b32.xlu1 %v738_v23, %s2142_s29  ;;  %v736_v25 = vld.sshfl [vmem:[#allocation1] sm:$0xff pattern:$0x73625140] }
  0x63   : > { %742 = vrot.lane.b32.xlu0 %v736_v25, %s2142_s29  ;;  %807 = vst [vmem:[#allocation1] ss:$4 sm:$0xff] %v247_v1 }
  0x66   : > { %746 = vrot.lane.b32.xlu2 %v740_v24, %s2142_s29 }
  0x6a   : > { %v810_v27 = vld.sshfl [vmem:[#allocation1 + $0x8] sm:$0xff pattern:$0x73625140]  ;;  %v812_v28 = vld.sshfl [vmem:[#allocation1 + $0x10] sm:$0xff pattern:$0x73625140] }
  0x6b   : > { %816 = vrot.lane.b32.xlu1 %v810_v27, %s2143_s6  ;;  %v808_v29 = vld.sshfl [vmem:[#allocation1] sm:$0xff pattern:$0x73625140] }
  0x6c   : > { %814 = vrot.lane.b32.xlu0 %v808_v29, %s2143_s6  ;;  %972 = vst [vmem:[#allocation1] ss:$4 sm:$0xff] %v2246_v26 }
  0x6e   : > { %818 = vrot.lane.b32.xlu2 %v812_v28, %s2143_s6 }
  0x73   : > { %v975_v30 = vld.sshfl [vmem:[#allocation1 + $0x8] sm:$0xff pattern:$0x73625140]  ;;  %v973_v31 = vld.sshfl [vmem:[#allocation1] sm:$0xff pattern:$0x73625140] }
  0x74   : > { %981 = vrot.lane.b32.xlu1 %v975_v30, %s2136_s23  ;;  %979 = vrot.lane.b32.xlu0 %v973_v31, %s2136_s23  ;;  %v977_v32 = vld.sshfl [vmem:[#allocation1 + $0x10] sm:$0xff pattern:$0x73625140] }
  0x75   : > { %1038 = vst [vmem:[#allocation1] ss:$4 sm:$0xff] %v2246_v26 }
  0x76   : > { %983 = vrot.lane.b32.xlu2 %v977_v32, %s2136_s23  ;;  %s2152_s23 = smov 100  }
  0x7c   : > { %v2265_v35 = vld.sshfl [vmem:[#allocation1] sm:$0xff pattern:$0x73625140]  ;;  %v2267_v36 = vld.sshfl [vmem:[#allocation1 + $0x8] sm:$0xff pattern:$0x73625140] }
  0x7d   : > { %v2269_v37 = vld.sshfl [vmem:[#allocation1 + $0x10] sm:$0xff pattern:$0x73625140] }
  0x7e   : > { %1091 = vst [vmem:[#allocation1] ss:$4 sm:$0xff] %v2246_v26 }
  0x85   : > { %v1094_v38 = vld.sshfl [vmem:[#allocation1 + $0x8] sm:$0xff pattern:$0x73625140]  ;;  %v1096_v39 = vld.sshfl [vmem:[#allocation1 + $0x10] sm:$0xff pattern:$0x73625140] }
  0x86   : > { %1100 = vrot.lane.b32.xlu1 %v1094_v38, %s2137_s24  ;;  %v1092_v40 = vld.sshfl [vmem:[#allocation1] sm:$0xff pattern:$0x73625140]  ;;  %1102 = vrot.lane.b32.xlu2 %v1096_v39, %s2137_s24 }
  0x87   : > { %1098 = vrot.lane.b32.xlu0 %v1092_v40, %s2137_s24  ;;  %1161 = vst [vmem:[#allocation1] ss:$4 sm:$0xff] %v2246_v26 }
  0x8e   : > { %v1164_v41 = vld.sshfl [vmem:[#allocation1 + $0x8] sm:$0xff pattern:$0x73625140]  ;;  %v1166_v42 = vld.sshfl [vmem:[#allocation1 + $0x10] sm:$0xff pattern:$0x73625140] }
  0x8f   : > { %1170 = vrot.lane.b32.xlu1 %v1164_v41, %s2138_s25  ;;  %v1162_v43 = vld.sshfl [vmem:[#allocation1] sm:$0xff pattern:$0x73625140]  ;;  %1172 = vrot.lane.b32.xlu2 %v1166_v42, %s2138_s25 }
  0x90   : > { %1168 = vrot.lane.b32.xlu0 %v1162_v43, %s2138_s25  ;;  %1231 = vst [vmem:[#allocation1] ss:$4 sm:$0xff] %v2246_v26  ;;  %v387_v44 = vpop.permute.xlu2 %386  ;;  %v1939_v43 = vld [vmem:[%s2629_s1 + $0x10] sm:$0xf] }
  0x91   : > { %v401_v60 = vsel %vm272_vm1, %v387_v44, 0 }
  0x95   : > { %v260_v45 = vpop.permute.xlu0 %259  ;;  %v264_v46 = vpop.permute.xlu1 %263 }
  0x96   : > { %v280_v47 = vsel %vm272_vm1, %v264_v46, 0 }
  0x97   : > { %315 = vmatpush.bf16.msra.mxu2 %v280_v47  ;;  %v1234_v49 = vld.sshfl [vmem:[#allocation1 + $0x8] sm:$0xff pattern:$0x73625140]  ;;  %v1236_v50 = vld.sshfl [vmem:[#allocation1 + $0x10] sm:$0xff pattern:$0x73625140] }
  0x98   : > { %1240 = vrot.lane.b32.xlu1 %v1234_v49, %s2139_s26  ;;  %v1232_v51 = vld.sshfl [vmem:[#allocation1] sm:$0xff pattern:$0x73625140]  ;;  %1242 = vrot.lane.b32.xlu2 %v1236_v50, %s2139_s26  ;;  %v383_v53 = vpop.permute.xlu2 %382 }
  0x99   : > { %1238 = vrot.lane.b32.xlu0 %v1232_v51, %s2139_s26  ;;  %1301 = vst [vmem:[#allocation1] ss:$4 sm:$0xff] %v2246_v26  ;;  %s2153_s26 = smov 102  }
  0x9a   : > { %1927 = vmatmul.msk.bf16.vlgmr.msra.gmra.mxu2 %vm268_vm2, %v1924_v48 }
  0x9d   : > { %v262_v52 = vpop.permute.xlu0 %261 }
  0x9e   : > { %v266_v54 = vsel %vm265_vm3, %v260_v45, %v262_v52  ;;  %v267_v55 = vsel %vm265_vm3, %v262_v52, %v264_v46 }
  0x9f   : > { %v274_v58 = vsel %vm272_vm1, %v266_v54, 0  ;;  %v277_v59 = vsel %vm272_vm1, %v267_v55, 0 }
  0xa0   : > { %289 = vmatpush.bf16.msra.mxu0 %v274_v58  ;;  %302 = vmatpush.bf16.msra.mxu1 %v277_v59  ;;  %v1306_v61 = vld.sshfl [vmem:[#allocation1 + $0x10] sm:$0xff pattern:$0x73625140]  ;;  %v1302_v62 = vld.sshfl [vmem:[#allocation1] sm:$0xff pattern:$0x73625140]  ;;  %v459_v0 = vpop.permute.xlu2 %458 }
  0xa1   : > { %1312 = vrot.lane.b32.xlu1 %v1306_v61, %s2140_s27  ;;  %v1304_v63 = vld.sshfl [vmem:[#allocation1 + $0x8] sm:$0xff pattern:$0x73625140]  ;;  %1308 = vrot.lane.b32.xlu2 %v1302_v62, %s2140_s27  ;;  %v473_v4 = vsel %vm272_vm1, %v459_v0, 0 }
  0xa2   : > { %1310 = vrot.lane.b32.xlu0 %v1304_v63, %s2140_s27  ;;  %1371 = vst [vmem:[#allocation1] ss:$4 sm:$0xff] %v2246_v26 }
  0xa3   : > { %1925 = vmatmul.msk.bf16.vlgmr.msra.gmra.mxu0 %vm268_vm2, %v1924_v48  ;;  %1926 = vmatmul.msk.bf16.vlgmr.msra.gmra.mxu1 %vm268_vm2, %v1924_v48 }
  0xa4   : > { %354 = vmatpush.bf16.msrb.mxu0 %v330_v56  ;;  %367 = vmatpush.bf16.msrb.mxu1 %v332_v57 }
  0xa7   : > { %v385_v1 = vpop.permute.xlu1 %384 }
  0xa8   : > { %436 = vmatpush.bf16.msra.mxu0 %v401_v60  ;;  %v389_v2 = vsel %vm388_vm4, %v383_v53, %v385_v1  ;;  %v390_v3 = vsel %vm388_vm4, %v385_v1, %v387_v44  ;;  %v531_v10 = vpop.permute.xlu2 %530  ;;  %v1943_v44 = vld [vmem:[%s2629_s1 + $0x14] sm:$0xf]  ;;  %v1947_v60 = vld [vmem:[%s2629_s1 + $0x18] sm:$0xf] }
  0xa9   : > { %v395_v5 = vsel %vm272_vm1, %v389_v2, 0  ;;  %v398_v6 = vsel %vm272_vm1, %v390_v3, 0  ;;  %v1376_v8 = vld.sshfl [vmem:[#allocation1 + $0x10] sm:$0xff pattern:$0x73625140]  ;;  %v545_v15 = vsel %vm272_vm1, %v531_v10, 0 }
  0xaa   : > { %410 = vmatpush.bf16.msrb.mxu2 %v395_v5  ;;  %423 = vmatpush.bf16.msrb.mxu3 %v398_v6  ;;  %v1374_v17 = vld.sshfl [vmem:[#allocation1 + $0x8] sm:$0xff pattern:$0x73625140]  ;;  %v1372_v18 = vld.sshfl [vmem:[#allocation1] sm:$0xff pattern:$0x73625140] }
  0xab   : > { %1382 = vrot.lane.b32.xlu2 %v1376_v8, %s2141_s28  ;;  %1380 = vrot.lane.b32.xlu1 %v1374_v17, %s2141_s28  ;;  %1441 = vst [vmem:[#allocation1] ss:$4 sm:$0xff] %v2246_v26 }
  0xac   : > { %1378 = vrot.lane.b32.xlu0 %v1372_v18, %s2141_s28  ;;  %s2154_s28 = smov 104  }
  0xad   : > { %1932 = vmatmul.msk.bf16.vlgmr.msrb.gmra.mxu2 %vm268_vm2, %v1931_v7  ;;  %1933 = vmatmul.msk.bf16.vlgmr.msrb.gmra.mxu3 %vm268_vm2, %v1931_v7 }
  0xae   : > { %508 = vmatpush.bf16.msra.mxu3 %v473_v4 }
  0xb0   : > { %v457_v9 = vpop.permute.xlu1 %456  ;;  %v603_v23 = vpop.permute.xlu2 %602 }
  0xb1   : > { %v462_v11 = vsel %vm460_vm5, %v457_v9, %v459_v0  ;;  %v455_v12 = vpop.permute.xlu0 %454  ;;  %v617_v31 = vsel %vm272_vm1, %v603_v23, 0 }
  0xb2   : > { %v470_v13 = vsel %vm272_vm1, %v462_v11, 0  ;;  %v461_v14 = vsel %vm460_vm5, %v455_v12, %v457_v9  ;;  %v1446_v28 = vld.sshfl [vmem:[#allocation1 + $0x10] sm:$0xff pattern:$0x73625140]  ;;  %v1045_v12 = vsel %vm272_vm1, %v2265_v35, 0 }
  0xb3   : > { %1929 = vmatmul.msk.bf16.vlgmr.msrb.gmra.mxu0 %vm268_vm2, %v2261_v34  ;;  %1930 = vmatmul.msk.bf16.vlgmr.msrb.gmra.mxu1 %vm268_vm2, %v2261_v34  ;;  %v467_v16 = vsel %vm272_vm1, %v461_v14, 0  ;;  %v1444_v29 = vld.sshfl [vmem:[#allocation1 + $0x8] sm:$0xff pattern:$0x73625140] }
  0xb4   : > { %482 = vmatpush.bf16.msra.mxu1 %v467_v16  ;;  %495 = vmatpush.bf16.msra.mxu2 %v470_v13  ;;  %v1442_v30 = vld.sshfl [vmem:[#allocation1] sm:$0xff pattern:$0x73625140]  ;;  %v1047_v13 = vsel %vm272_vm1, %v2267_v36, 0 }
  0xb5   : > { %1450 = vrot.lane.b32.xlu1 %v1444_v29, %s2142_s29  ;;  %1511 = vst [vmem:[#allocation1] ss:$4 sm:$0xff] %v2246_v26  ;;  %1448 = vrot.lane.b32.xlu0 %v1442_v30, %s2142_s29 }
  0xb6   : > { %1452 = vrot.lane.b32.xlu2 %v1446_v28, %s2142_s29  ;;  %s2155_s29 = smov 98  }
  0xb8   : > { %580 = vmatpush.bf16.msrb.mxu2 %v545_v15  ;;  %v671_v33 = vpop.permute.xlu2 %670 }
  0xb9   : > { %v529_v19 = vpop.permute.xlu1 %528 }
  0xba   : > { %v534_v21 = vsel %vm532_vm6, %v529_v19, %v531_v10  ;;  %v527_v22 = vpop.permute.xlu0 %526  ;;  %v1951_v10 = vld [vmem:[%s2629_s1 + $0x1c] sm:$0xf] }
  0xbb   : > { %v542_v24 = vsel %vm272_vm1, %v534_v21, 0  ;;  %v533_v25 = vsel %vm532_vm6, %v527_v22, %v529_v19  ;;  %v1955_v19 = vld [vmem:[%s2629_s1 + $0x20] sm:$0xf] }
  0xbc   : > { %v539_v27 = vsel %vm272_vm1, %v533_v25, 0  ;;  %567 = vmatpush.bf16.msrb.mxu1 %v542_v24  ;;  %v1514_v41 = vld.sshfl [vmem:[#allocation1 + $0x8] sm:$0xff pattern:$0x73625140] }
  0xbd   : > { %1937 = vmatmul.msk.bf16.vlgmr.msra.gmra.mxu2 %vm268_vm2, %v1935_v20  ;;  %1938 = vmatmul.msk.bf16.vlgmr.msra.gmra.mxu3 %vm268_vm2, %v1935_v20  ;;  %v1512_v42 = vld.sshfl [vmem:[#allocation1] sm:$0xff pattern:$0x73625140]  ;;  %v1516_v0 = vld.sshfl [vmem:[#allocation1 + $0x10] sm:$0xff pattern:$0x73625140] }
  0xbe   : > { %554 = vmatpush.bf16.msrb.mxu0 %v539_v27  ;;  %1520 = vrot.lane.b32.xlu1 %v1514_v41, %s2143_s6  ;;  %v1049_v27 = vsel %vm272_vm1, %v2269_v37, 0 }
  0xbf   : > { %1518 = vrot.lane.b32.xlu0 %v1512_v42, %s2143_s6  ;;  %1522 = vrot.lane.b32.xlu2 %v1516_v0, %s2143_s6 }
  0xc0   : > { %v747_v45 = vpop.permute.xlu2 %746 }
  0xc1   : > { %v761_v50 = vsel %vm272_vm1, %v747_v45, 0 }
  0xc2   : > { %v601_v32 = vpop.permute.xlu1 %600 }
  0xc3   : > { %1934 = vmatmul.msk.bf16.vlgmr.msra.gmra.mxu0 %vm268_vm2, %v1931_v7  ;;  %1936 = vmatmul.msk.bf16.vlgmr.msra.gmra.mxu1 %vm268_vm2, %v1935_v20  ;;  %v606_v34 = vsel %vm604_vm7, %v601_v32, %v603_v23  ;;  %v599_v38 = vpop.permute.xlu0 %598  ;;  %v1960_v20 = vld [vmem:[%s2629_s1 + $0x4] sm:$0xf]  ;;  %v343_v23 = vpop.f32.mrf.mxu3 }
  0xc4   : > { %v614_v39 = vsel %vm272_vm1, %v606_v34, 0  ;;  %v605_v26 = vsel %vm604_vm7, %v599_v38, %v601_v32  ;;  %652 = vmatpush.bf16.msra.mxu1 %v617_v31  ;;  %v969_v32 = vld [vmem:[%s2629_s1] sm:$0xf] }
  0xc5   : > { %v611_v40 = vsel %vm272_vm1, %v605_v26, 0  ;;  %639 = vmatpush.bf16.msra.mxu0 %v614_v39 }
  0xc6   : > { %626 = vmatpush.bf16.msrb.mxu3 %v611_v40 }
  0xc8   : > { %v819_v61 = vpop.permute.xlu2 %818 }
  0xc9   : > { %v833_v62 = vsel %vm272_vm1, %v819_v61, 0 }
  0xcb   : > { %v675_v46 = vpop.permute.xlu1 %674  ;;  %v345_v31 = vpop.f32.mrf.mxu3 }
  0xcc   : > { %v673_v47 = vpop.permute.xlu0 %672  ;;  %v689_v53 = vsel %vm272_vm1, %v675_v46, 0 }
  0xcd   : > { %1942 = vmatmul.msk.bf16.vlgmr.msrb.gmra.mxu2 %vm268_vm2, %v1939_v43  ;;  %1944 = vmatmul.msk.bf16.vlgmr.msrb.gmra.mxu3 %vm268_vm2, %v1943_v44  ;;  %v678_v48 = vsel %vm676_vm8, %v673_v47, %v675_v46  ;;  %v677_v49 = vsel %vm676_vm8, %v671_v33, %v673_v47 }
  0xce   : > { %v686_v51 = vsel %vm272_vm1, %v678_v48, 0  ;;  %v683_v52 = vsel %vm272_vm1, %v677_v49, 0  ;;  %v1967_v49 = vld [vmem:[%s2629_s1 + $0x8] sm:$0xf] }
  0xcf   : > { %698 = vmatpush.bf16.msra.mxu2 %v683_v52  ;;  %711 = vmatpush.bf16.msra.mxu3 %v686_v51 }
  0xd0   : > { %v984_v11 = vpop.permute.xlu2 %983 }
  0xd1   : > { %v997_v15 = vsel %vm272_vm1, %v984_v11, 0 }
  0xd3   : > { %796 = vmatpush.bf16.msrb.mxu3 %v761_v50  ;;  %1940 = vmatmul.msk.bf16.vlgmr.msrb.gmra.mxu0 %vm268_vm2, %v1939_v43 }
  0xd4   : > { %1941 = vmatmul.msk.bf16.vlgmr.msrb.gmra.mxu1 %vm268_vm2, %v1939_v43  ;;  %724 = vmatpush.bf16.msrb.mxu0 %v689_v53  ;;  %v745_v54 = vpop.permute.xlu1 %744 }
  0xd5   : > { %v750_v55 = vsel %vm748_vm9, %v745_v54, %v747_v45  ;;  %v743_v56 = vpop.permute.xlu0 %742 }
  0xd6   : > { %v758_v57 = vsel %vm272_vm1, %v750_v55, 0  ;;  %v749_v58 = vsel %vm748_vm9, %v743_v56, %v745_v54 }
  0xd7   : > { %v755_v59 = vsel %vm272_vm1, %v749_v58, 0  ;;  %783 = vmatpush.bf16.msrb.mxu2 %v758_v57 }
  0xd8   : > { %770 = vmatpush.bf16.msrb.mxu1 %v755_v59 }
  0xdd   : > { %1948 = vmatmul.msk.bf16.vlgmr.msra.gmra.mxu2 %vm268_vm2, %v1947_v60  ;;  %1949 = vmatmul.msk.bf16.vlgmr.msra.gmra.mxu3 %vm268_vm2, %v1947_v60  ;;  %v817_v63 = vpop.permute.xlu1 %816 }
  0xde   : > { %v822_v1 = vsel %vm820_vm10, %v817_v63, %v819_v61  ;;  %v815_v2 = vpop.permute.xlu0 %814  ;;  %868 = vmatpush.bf16.msra.mxu2 %v833_v62 }
  0xdf   : > { %v821_v3 = vsel %vm820_vm10, %v815_v2, %v817_v63  ;;  %v830_v4 = vsel %vm272_vm1, %v822_v1, 0  ;;  %v1971_v2 = vld [vmem:[%s2629_s1 + $0xc] sm:$0xf] }
  0xe0   : > { %v827_v5 = vsel %vm272_vm1, %v821_v3, 0  ;;  %v1103_v35 = vpop.permute.xlu2 %1102  ;;  %v1975_v3 = vld [vmem:[%s2629_s1 + $0x10] sm:$0xf] }
  0xe1   : > { %v1116_v21 = vsel %vm272_vm1, %v1103_v35, 0 }
  0xe3   : > { %1945 = vmatmul.msk.bf16.vlgmr.msra.gmra.mxu0 %vm268_vm2, %v1943_v44 }
  0xe4   : > { %1946 = vmatmul.msk.bf16.vlgmr.msra.gmra.mxu1 %vm268_vm2, %v1943_v44  ;;  %842 = vmatpush.bf16.msra.mxu0 %v827_v5 }
  0xe5   : > { %855 = vmatpush.bf16.msra.mxu1 %v830_v4 }
  0xe6   : > { %v982_v6 = vpop.permute.xlu1 %981  ;;  %v980_v7 = vpop.permute.xlu0 %979 }
  0xe7   : > { %v985_v8 = vsel %vm265_vm3, %v980_v7, %v982_v6  ;;  %v986_v14 = vsel %vm265_vm3, %v982_v6, %v984_v11  ;;  %vm927_vm3 = vcmask 818176  }
  0xe8   : > { %v991_v9 = vsel %vm272_vm1, %v985_v8, 0  ;;  %v994_v16 = vsel %vm272_vm1, %v986_v14, 0 }
  0xe9   : > { %1006 = vmatpush.bf16.msra.mxu3 %v991_v9  ;;  %v1173_v30 = vpop.permute.xlu2 %1172 }
  0xea   : > { %v1186_v34 = vsel %vm272_vm1, %v1173_v30, 0 }
  0xed   : > { %1953 = vmatmul.msk.bf16.vlgmr.msrb.gmra.mxu2 %vm268_vm2, %v1951_v10  ;;  %1954 = vmatmul.msk.bf16.vlgmr.msrb.gmra.mxu3 %vm268_vm2, %v1951_v10 }
  0xee   : > { %1058 = vmatpush.bf16.msrb.mxu2 %v1045_v12  ;;  %1071 = vmatpush.bf16.msrb.mxu3 %v1047_v13 }
  0xf2   : > { %v1243_v39 = vpop.permute.xlu2 %1242 }
  0xf3   : > { %1950 = vmatmul.msk.bf16.vlgmr.msrb.gmra.mxu0 %vm268_vm2, %v1947_v60  ;;  %v1256_v57 = vsel %vm272_vm1, %v1243_v39, 0 }
  0xf4   : > { %1952 = vmatmul.msk.bf16.vlgmr.msrb.gmra.mxu1 %vm268_vm2, %v1951_v10  ;;  %1019 = vmatpush.bf16.msrb.mxu0 %v994_v16 }
  0xf5   : > { %1032 = vmatpush.bf16.msrb.mxu1 %v997_v15 }
  0xf8   : > { %v1101_v36 = vpop.permute.xlu1 %1100 }
  0xf9   : > { %v1105_v17 = vsel %vm388_vm4, %v1101_v36, %v1103_v35  ;;  %v1099_v18 = vpop.permute.xlu0 %1098 }
  0xfa   : > { %v1113_v22 = vsel %vm272_vm1, %v1105_v17, 0  ;;  %v1104_v24 = vsel %vm388_vm4, %v1099_v18, %v1101_v36  ;;  %vm964_vm4 = vcmask 7168  }
  0xfb   : > { %v1110_v25 = vsel %vm272_vm1, %v1104_v24, 0  ;;  %v1309_v44 = vpop.permute.xlu2 %1308 }
  0xfd   : > { %1958 = vmatmul.msk.bf16.vlgmr.msra.gmra.mxu2 %vm268_vm2, %v1955_v19  ;;  %1961 = vmatmul.msk.bf16.vlgmr.msra.gmra.mxu3 %vm268_vm2, %v1960_v20 }
  0xfe   : > { %1138 = vmatpush.bf16.msra.mxu2 %v1113_v22  ;;  %1151 = vmatpush.bf16.msra.mxu3 %v1116_v21  ;;  %v1979_v21 = vld [vmem:[%s2629_s1 + $0x14] sm:$0xf] }
 0x101   : > { %v1171_v28 = vpop.permute.xlu1 %1170 }
 0x102   : > { %v1169_v29 = vpop.permute.xlu0 %1168  ;;  %v1175_v40 = vsel %vm460_vm5, %v1171_v28, %v1173_v30 }
 0x103   : > { %1956 = vmatmul.msk.bf16.vlgmr.msra.gmra.mxu0 %vm268_vm2, %v1955_v19  ;;  %v1174_v41 = vsel %vm460_vm5, %v1169_v29, %v1171_v28  ;;  %v1183_v42 = vsel %vm272_vm1, %v1175_v40, 0 }
 0x104   : > { %1957 = vmatmul.msk.bf16.vlgmr.msra.gmra.mxu1 %vm268_vm2, %v1955_v19  ;;  %1084 = vmatpush.bf16.msra.mxu0 %v1049_v27  ;;  %v1180_v43 = vsel %vm272_vm1, %v1174_v41, 0 }
 0x105   : > { %1125 = vmatpush.bf16.msra.mxu1 %v1110_v25  ;;  %v1383_v60 = vpop.permute.xlu2 %1382 }
 0x106   : > { %v1396_v4 = vsel %vm272_vm1, %v1383_v60, 0 }
 0x10a   : > { %v1241_v33 = vpop.permute.xlu1 %1240 }
 0x10b   : > { %v1239_v38 = vpop.permute.xlu0 %1238  ;;  %v1245_v53 = vsel %vm532_vm6, %v1241_v33, %v1243_v39 }
 0x10c   : > { %v1244_v37 = vsel %vm532_vm6, %v1239_v38, %v1241_v33  ;;  %v1253_v58 = vsel %vm272_vm1, %v1245_v53, 0 }
 0x10d   : > { %1964 = vmatmul.msk.bf16.vlgmr.msrb.gmra.mxu2 %vm268_vm2, %v969_v32  ;;  %1965 = vmatmul.msk.bf16.vlgmr.msrb.gmra.mxu3 %vm268_vm2, %v969_v32  ;;  %v1250_v26 = vsel %vm272_vm1, %v1244_v37, 0 }
 0x10e   : > { %1221 = vmatpush.bf16.msrb.mxu2 %v1186_v34  ;;  %1265 = vmatpush.bf16.msrb.mxu3 %v1250_v26 }
 0x110   : > { %v1453_v22 = vpop.permute.xlu2 %1452 }
 0x111   : > { %v1466_v24 = vsel %vm272_vm1, %v1453_v22, 0 }
 0x113   : > { %1962 = vmatmul.msk.bf16.vlgmr.msrb.gmra.mxu0 %vm268_vm2, %v1960_v20  ;;  %v1313_v45 = vpop.permute.xlu1 %1312 }
 0x114   : > { %1963 = vmatmul.msk.bf16.vlgmr.msrb.gmra.mxu1 %vm268_vm2, %v1960_v20  ;;  %1195 = vmatpush.bf16.msrb.mxu0 %v1180_v43  ;;  %v1311_v46 = vpop.permute.xlu0 %1310  ;;  %v1326_v13 = vsel %vm272_vm1, %v1313_v45, 0 }
 0x115   : > { %1208 = vmatpush.bf16.msrb.mxu1 %v1183_v42  ;;  %v1315_v47 = vsel %vm604_vm7, %v1311_v46, %v1313_v45  ;;  %v1314_v48 = vsel %vm604_vm7, %v1309_v44, %v1311_v46  ;;  %v1983_v45 = vld [vmem:[%s2629_s1 + $0x18] sm:$0xf] }
 0x116   : > { %v1323_v50 = vsel %vm272_vm1, %v1315_v47, 0  ;;  %v1320_v51 = vsel %vm272_vm1, %v1314_v48, 0 }
 0x119   : > { %v1523_v46 = vpop.permute.xlu2 %1522 }
 0x11a   : > { %v1536_v53 = vsel %vm272_vm1, %v1523_v46, 0 }
 0x11d   : > { %1969 = vmatmul.msk.bf16.vlgmr.msra.gmra.mxu2 %vm268_vm2, %v1967_v49  ;;  %v317_v52 = vpop.f32.mrf.mxu2  ;;  %1970 = vmatmul.msk.bf16.vlgmr.msra.gmra.mxu3 %vm268_vm2, %v1967_v49  ;;  %v1381_v61 = vpop.permute.xlu1 %1380 }
 0x11e   : > { %1335 = vmatpush.bf16.msra.mxu2 %v1320_v51  ;;  %1348 = vmatpush.bf16.msra.mxu3 %v1323_v50  ;;  %v1385_v0 = vsel %vm676_vm8, %v1381_v61, %v1383_v60  ;;  %v1379_v1 = vpop.permute.xlu0 %1378  ;;  %v1991_v60 = vld [vmem:[%s2629_s1 + $0x20] sm:$0xf] }
 0x11f   : > { %v1393_v5 = vsel %vm272_vm1, %v1385_v0, 0  ;;  %v1384_v6 = vsel %vm676_vm8, %v1379_v1, %v1381_v61 }
 0x120   : > { %v291_v54 = vpop.f32.mrf.mxu0  ;;  %v304_v55 = vpop.f32.mrf.mxu1  ;;  %v1390_v14 = vsel %vm272_vm1, %v1384_v6, 0 }
 0x121   : > { %v344_v56 = vadd.f32 %v343_v23, %v291_v54 }
 0x123   : > { %1966 = vmatmul.msk.bf16.vlgmr.msra.gmra.mxu0 %vm268_vm2, %v969_v32 }
 0x124   : > { %1968 = vmatmul.msk.bf16.vlgmr.msra.gmra.mxu1 %vm268_vm2, %v1967_v49  ;;  %1278 = vmatpush.bf16.msra.mxu0 %v1253_v58 }
 0x125   : > { %1291 = vmatpush.bf16.msra.mxu1 %v1256_v57  ;;  %v319_v59 = vpop.f32.mrf.mxu2 }
 0x126   : > { %v1987_v59 = vld [vmem:[%s2629_s1 + $0x1c] sm:$0xf] }
 0x127   : > { %v1451_v16 = vpop.permute.xlu1 %1450  ;;  %v1449_v35 = vpop.permute.xlu0 %1448 }
 0x128   : > { %v293_v62 = vpop.f32.mrf.mxu0  ;;  %v306_v63 = vpop.f32.mrf.mxu1  ;;  %v1455_v29 = vsel %vm748_vm9, %v1451_v16, %v1453_v22  ;;  %v1454_v30 = vsel %vm748_vm9, %v1449_v35, %v1451_v16 }
 0x129   : > { %v1463_v39 = vsel %vm272_vm1, %v1455_v29, 0  ;;  %v1460_v26 = vsel %vm272_vm1, %v1454_v30, 0 }
 0x12d   : > { %1974 = vmatmul.msk.bf16.vlgmr.msrb.gmra.mxu2 %vm268_vm2, %v1971_v2  ;;  %1976 = vmatmul.msk.bf16.vlgmr.msrb.gmra.mxu3 %vm268_vm2, %v1975_v3 }
 0x12e   : > { %1418 = vmatpush.bf16.msrb.mxu2 %v1393_v5  ;;  %1431 = vmatpush.bf16.msrb.mxu3 %v1396_v4 }
 0x130   : > { %v412_v7 = vpop.f32.mrf.mxu2  ;;  %v356_v8 = vpop.f32.mrf.mxu0 }
 0x131   : > { %v2455_v9 = vadd.f32 %v412_v7, %v344_v56  ;;  %v357_v10 = vadd.f32 %v356_v8, %v304_v55  ;;  %v369_v11 = vpop.f32.mrf.mxu1  ;;  %v425_v12 = vpop.f32.mrf.mxu3 }
 0x132   : > { %v370_v15 = vadd.f32 %v369_v11, %v317_v52  ;;  %v1521_v23 = vpop.permute.xlu1 %1520  ;;  %v1519_v25 = vpop.permute.xlu0 %1518 }
 0x133   : > { %v443_v36 = vadd.f32 %v425_v12, %v357_v10  ;;  %1972 = vmatmul.msk.bf16.vlgmr.msrb.gmra.mxu0 %vm268_vm2, %v1971_v2  ;;  %v1524_v27 = vsel %vm820_vm10, %v1519_v25, %v1521_v23  ;;  %v1525_v47 = vsel %vm820_vm10, %v1521_v23, %v1523_v46 }
 0x134   : > { %1973 = vmatmul.msk.bf16.vlgmr.msrb.gmra.mxu1 %vm268_vm2, %v1971_v2  ;;  %1361 = vmatpush.bf16.msrb.mxu0 %v1326_v13  ;;  %v1530_v28 = vsel %vm272_vm1, %v1524_v27, 0  ;;  %v1533_v54 = vsel %vm272_vm1, %v1525_v47, 0  ;;  %vm943_vm1 = vcmask 785408  }
 0x135   : > { %1405 = vmatpush.bf16.msrb.mxu1 %v1390_v14 }
 0x138   : > { %v414_v17 = vpop.f32.mrf.mxu2  ;;  %v358_v18 = vpop.f32.mrf.mxu0 }
 0x139   : > { %v371_v19 = vpop.f32.mrf.mxu1  ;;  %v427_v20 = vpop.f32.mrf.mxu3 }
 0x13d   : > { %1980 = vmatmul.msk.bf16.vlgmr.msra.gmra.mxu2 %vm268_vm2, %v1979_v21  ;;  %1981 = vmatmul.msk.bf16.vlgmr.msra.gmra.mxu3 %vm268_vm2, %v1979_v21 }
 0x13e   : > { %1501 = vmatpush.bf16.msra.mxu2 %v1466_v24  ;;  %1545 = vmatpush.bf16.msra.mxu3 %v1530_v28 }
 0x140   : > { %v497_v31 = vpop.f32.mrf.mxu2  ;;  %v438_v32 = vpop.f32.mrf.mxu0 }
 0x141   : > { %v2471_v33 = vadd.f32 %v497_v31, %v443_v36  ;;  %v444_v34 = vadd.f32 %v438_v32, %v370_v15  ;;  %v484_v38 = vpop.f32.mrf.mxu1  ;;  %v510_v37 = vpop.f32.mrf.mxu3 }
 0x142   : > { %v514_v11 = vadd.f32 %v484_v38, %v2455_v9 }
 0x143   : > { %v516_v40 = vadd.f32 %v510_v37, %v444_v34  ;;  %1977 = vmatmul.msk.bf16.vlgmr.msra.gmra.mxu0 %vm268_vm2, %v1975_v3 }
 0x144   : > { %1978 = vmatmul.msk.bf16.vlgmr.msra.gmra.mxu1 %vm268_vm2, %v1975_v3  ;;  %1475 = vmatpush.bf16.msra.mxu0 %v1460_v26 }
 0x145   : > { %1488 = vmatpush.bf16.msra.mxu1 %v1463_v39 }
 0x148   : > { %v499_v41 = vpop.f32.mrf.mxu2  ;;  %v440_v42 = vpop.f32.mrf.mxu0 }
 0x149   : > { %v486_v43 = vpop.f32.mrf.mxu1  ;;  %v512_v44 = vpop.f32.mrf.mxu3 }
 0x14d   : > { %1985 = vmatmul.msk.bf16.vlgmr.msrb.gmra.mxu2 %vm268_vm2, %v1983_v45  ;;  %1986 = vmatmul.msk.bf16.vlgmr.msrb.gmra.mxu3 %vm268_vm2, %v1983_v45 }
 0x150   : > { %v582_v48 = vpop.f32.mrf.mxu2  ;;  %v556_v49 = vpop.f32.mrf.mxu0 }
 0x151   : > { %v588_v50 = vadd.f32 %v582_v48, %v516_v40  ;;  %v569_v51 = vpop.f32.mrf.mxu1  ;;  %v628_v52 = vpop.f32.mrf.mxu3  ;;  %v586_v12 = vadd.f32 %v556_v49, %v514_v11 }
 0x152   : > { %v587_v9 = vadd.f32 %v569_v51, %v2471_v33 }
 0x153   : > { %1982 = vmatmul.msk.bf16.vlgmr.msrb.gmra.mxu0 %vm268_vm2, %v1979_v21  ;;  %v658_v35 = vadd.f32 %v628_v52, %v586_v12 }
 0x154   : > { %1984 = vmatmul.msk.bf16.vlgmr.msrb.gmra.mxu1 %vm268_vm2, %v1983_v45  ;;  %1558 = vmatpush.bf16.msrb.mxu0 %v1533_v54 }
 0x155   : > { %1571 = vmatpush.bf16.msrb.mxu1 %v1536_v53 }
 0x158   : > { %v584_v55 = vpop.f32.mrf.mxu2  ;;  %v558_v56 = vpop.f32.mrf.mxu0 }
 0x159   : > { %v571_v57 = vpop.f32.mrf.mxu1  ;;  %v630_v58 = vpop.f32.mrf.mxu3 }
 0x15d   : > { %1990 = vmatmul.msk.bf16.vlgmr.msra.gmra.mxu2 %vm268_vm2, %v1987_v59  ;;  %1992 = vmatmul.msk.bf16.vlgmr.msra.gmra.mxu3 %vm268_vm2, %v1991_v60 }
 0x160   : > { %v700_v61 = vpop.f32.mrf.mxu2  ;;  %v641_v62 = vpop.f32.mrf.mxu0 }
 0x161   : > { %v654_v63 = vpop.f32.mrf.mxu1  ;;  %v713_v0 = vpop.f32.mrf.mxu3  ;;  %v730_v36 = vadd.f32 %v700_v61, %v658_v35  ;;  %v659_v25 = vadd.f32 %v641_v62, %v587_v9 }
 0x162   : > { %v2495_v1 = vadd.f32 %v654_v63, %v588_v50 }
 0x163   : > { %1988 = vmatmul.msk.bf16.vlgmr.msra.gmra.mxu0 %vm268_vm2, %v1987_v59  ;;  %v731_v29 = vadd.f32 %v713_v0, %v659_v25 }
 0x164   : > { %1989 = vmatmul.msk.bf16.vlgmr.msra.gmra.mxu1 %vm268_vm2, %v1987_v59 }
 0x168   : > { %v702_v2 = vpop.f32.mrf.mxu2  ;;  %v643_v3 = vpop.f32.mrf.mxu0 }
 0x169   : > { %v656_v4 = vpop.f32.mrf.mxu1  ;;  %v715_v5 = vpop.f32.mrf.mxu3 }
 0x170   : > { %v785_v6 = vpop.f32.mrf.mxu2  ;;  %v2499_v7 = vpop.f32.mrf.mxu0 }
 0x171   : > { %v772_v8 = vpop.f32.mrf.mxu1  ;;  %v2501_v10 = vpop.f32.mrf.mxu3  ;;  %v803_v30 = vadd.f32 %v785_v6, %v731_v29  ;;  %v732_v49 = vadd.f32 %v2499_v7, %v2495_v1 }
 0x172   : > { %v802_v17 = vadd.f32 %v772_v8, %v730_v36 }
 0x173   : > { %1993 = vmatmul.msk.bf16.vlgmr.msrb.gmra.mxu0 %vm268_vm2, %v1991_v60  ;;  %v804_v51 = vadd.f32 %v2501_v10, %v732_v49 }
 0x174   : > { %1994 = vmatmul.msk.bf16.vlgmr.msrb.gmra.mxu1 %vm268_vm2, %v1991_v60  ;;  %vm945_vm2 = vcmask 916480  }
 0x178   : > { %v787_v13 = vpop.f32.mrf.mxu2  ;;  %v728_v14 = vpop.f32.mrf.mxu0 }
 0x179   : > { %v774_v15 = vpop.f32.mrf.mxu1  ;;  %v800_v16 = vpop.f32.mrf.mxu3 }
 0x180   : > { %v870_v18 = vpop.f32.mrf.mxu2  ;;  %v844_v19 = vpop.f32.mrf.mxu0 }
 0x181   : > { %v2506_v20 = vadd.f32 %v844_v19, %v802_v17  ;;  %v857_v21 = vpop.f32.mrf.mxu1  ;;  %v1008_v22 = vpop.f32.mrf.mxu3  ;;  %v876_v54 = vadd.f32 %v870_v18, %v804_v51 }
 0x182   : > { %v875_v33 = vadd.f32 %v857_v21, %v803_v30 }
 0x183   : > { %884 = vrot.lane.b32.xlu2 %v2506_v20, %s2144_s9  ;;  %881 = vrot.lane.b32.xlu1 %v2506_v20, %s2145_s10 }
 0x184   : > { %878 = vrot.lane.b32.xlu0 %v2506_v20, %s2137_s24 }
 0x188   : > { %v872_v23 = vpop.f32.mrf.mxu2  ;;  %v846_v24 = vpop.f32.mrf.mxu0 }
 0x189   : > { %v859_v27 = vpop.f32.mrf.mxu1  ;;  %v1010_v28 = vpop.f32.mrf.mxu3 }
 0x18b   : > { %893 = vrot.lane.b32.xlu2 %v2506_v20, %s2146_s11  ;;  %890 = vrot.lane.b32.xlu1 %v2506_v20, %s2147_s12 }
 0x18c   : > { %887 = vrot.lane.b32.xlu0 %v2506_v20, %s2148_s13 }
 0x190   : > { %v1060_v31 = vpop.f32.mrf.mxu2  ;;  %v1021_v32 = vpop.f32.mrf.mxu0 }
 0x191   : > { %v1061_v34 = vadd.f32 %v1060_v31, %v1008_v22  ;;  %v1034_v38 = vpop.f32.mrf.mxu1  ;;  %v1073_v37 = vpop.f32.mrf.mxu3 }
 0x192   : > { %v1074_v39 = vadd.f32 %v1073_v37, %v1021_v32 }
 0x193   : > { %904 = vrot.lane.b32.xlu2 %v875_v33, %s2149_s14  ;;  %899 = vrot.lane.b32.xlu1 %v875_v33, %s2150_s21 }
 0x194   : > { %897 = vrot.lane.b32.xlu0 %v2506_v20, %s2150_s21 }
 0x198   : > { %v1062_v26 = vpop.f32.mrf.mxu2  ;;  %v1023_v40 = vpop.f32.mrf.mxu0 }
 0x199   : > { %v1036_v41 = vpop.f32.mrf.mxu1  ;;  %v1075_v42 = vpop.f32.mrf.mxu3 }
 0x19b   : > { %913 = vrot.lane.b32.xlu2 %v875_v33, %s2151_s22  ;;  %910 = vrot.lane.b32.xlu1 %v875_v33, %s2140_s27 }
 0x19c   : > { %907 = vrot.lane.b32.xlu0 %v875_v33, %s2138_s25 }
 0x1a0   : > { %v1140_v43 = vpop.f32.mrf.mxu2  ;;  %v1086_v44 = vpop.f32.mrf.mxu0 }
 0x1a1   : > { %v1158_v45 = vadd.f32 %v1140_v43, %v1074_v39  ;;  %v1087_v46 = vadd.f32 %v1086_v44, %v1034_v38  ;;  %v1127_v47 = vpop.f32.mrf.mxu1  ;;  %v1153_v48 = vpop.f32.mrf.mxu3 }
 0x1a2   : > { %v1157_v15 = vadd.f32 %v1127_v47, %v1061_v34 }
 0x1a3   : > { %v1159_v50 = vadd.f32 %v1153_v48, %v1087_v46  ;;  %923 = vrot.lane.b32.xlu2 %v875_v33, %s2152_s23  ;;  %919 = vrot.lane.b32.xlu1 %v875_v33, %s2153_s26 }
 0x1a4   : > { %916 = vrot.lane.b32.xlu0 %v875_v33, %s2154_s28 }
 0x1a8   : > { %v1142_v52 = vpop.f32.mrf.mxu2  ;;  %v1088_v53 = vpop.f32.mrf.mxu0 }
 0x1a9   : > { %v1129_v55 = vpop.f32.mrf.mxu1  ;;  %v1155_v56 = vpop.f32.mrf.mxu3 }
 0x1ab   : > { %930 = vrot.lane.b32.xlu1 %v876_v54, %s2155_s29 }
 0x1ac   : > { %925 = vrot.lane.b32.xlu0 %v876_v54, %s2152_s23 }
 0x1b0   : > { %v1223_v57 = vpop.f32.mrf.mxu2  ;;  %v1197_v58 = vpop.f32.mrf.mxu0 }
 0x1b1   : > { %v1229_v59 = vadd.f32 %v1223_v57, %v1159_v50  ;;  %v1210_v60 = vpop.f32.mrf.mxu1  ;;  %v1267_v61 = vpop.f32.mrf.mxu3  ;;  %v1227_v16 = vadd.f32 %v1197_v58, %v1157_v15 }
 0x1b2   : > { %v1228_v29 = vadd.f32 %v1210_v60, %v1158_v45 }
 0x1b3   : > { %v1297_v19 = vadd.f32 %v1267_v61, %v1227_v16 }
 0x1b8   : > { %v1225_v62 = vpop.f32.mrf.mxu2  ;;  %v1199_v63 = vpop.f32.mrf.mxu0 }
 0x1b9   : > { %v1212_v0 = vpop.f32.mrf.mxu1  ;;  %v1269_v1 = vpop.f32.mrf.mxu3 }
 0x1c0   : > { %v1337_v2 = vpop.f32.mrf.mxu2  ;;  %v1280_v3 = vpop.f32.mrf.mxu0 }
 0x1c1   : > { %v1293_v4 = vpop.f32.mrf.mxu1  ;;  %v1350_v5 = vpop.f32.mrf.mxu3  ;;  %v1367_v21 = vadd.f32 %v1337_v2, %v1297_v19  ;;  %v1298_v30 = vadd.f32 %v1280_v3, %v1228_v29 }
 0x1c2   : > { %v1299_v46 = vadd.f32 %v1293_v4, %v1229_v59 }
 0x1c3   : > { %v1368_v38 = vadd.f32 %v1350_v5, %v1298_v30 }
 0x1c8   : > { %v1339_v6 = vpop.f32.mrf.mxu2  ;;  %v1282_v7 = vpop.f32.mrf.mxu0 }
 0x1c9   : > { %v1295_v8 = vpop.f32.mrf.mxu1  ;;  %v1352_v10 = vpop.f32.mrf.mxu3 }
 0x1d0   : > { %v1420_v11 = vpop.f32.mrf.mxu2  ;;  %v1363_v12 = vpop.f32.mrf.mxu0 }
 0x1d1   : > { %v1407_v13 = vpop.f32.mrf.mxu1  ;;  %v1433_v14 = vpop.f32.mrf.mxu3  ;;  %v1438_v37 = vadd.f32 %v1420_v11, %v1368_v38  ;;  %v1369_v49 = vadd.f32 %v1363_v12, %v1299_v46 }
 0x1d2   : > { %v1437_v22 = vadd.f32 %v1407_v13, %v1367_v21 }
 0x1d3   : > { %v1439_v53 = vadd.f32 %v1433_v14, %v1369_v49 }
 0x1d8   : > { %v1422_v35 = vpop.f32.mrf.mxu2  ;;  %v1365_v36 = vpop.f32.mrf.mxu0 }
 0x1d9   : > { %v1409_v17 = vpop.f32.mrf.mxu1  ;;  %v1435_v18 = vpop.f32.mrf.mxu3 }
 0x1dd   : > { %v885_v43 = vpop.permute.xlu2 %884 }
 0x1e0   : > { %v1503_v9 = vpop.f32.mrf.mxu2  ;;  %v1477_v23 = vpop.f32.mrf.mxu0 }
 0x1e1   : > { %v1507_v24 = vadd.f32 %v1477_v23, %v1437_v22  ;;  %v1490_v25 = vpop.f32.mrf.mxu1  ;;  %v1547_v27 = vpop.f32.mrf.mxu3  ;;  %v1509_v56 = vadd.f32 %v1503_v9, %v1439_v53  ;;  %v959_v53 = vld [vmem:[#allocation3] sm:$0xff] }
 0x1e2   : > { %v1508_v39 = vadd.f32 %v1490_v25, %v1438_v37 }
 0x1e3   : > { %v2536_v28 = vadd.f32 %v1547_v27, %v1507_v24 }
 0x1e5   : > { %1581 = vrot.lane.b32.xlu2 %v2536_v28, %s2137_s24  ;;  %1587 = vrot.lane.b32.xlu1 %v2536_v28, %s2144_s9  ;;  %v894_v54 = vpop.permute.xlu2 %893 }
 0x1e6   : > { %1590 = vrot.lane.b32.xlu0 %v2536_v28, %s2148_s13 }
 0x1e8   : > { %v1479_v31 = vpop.f32.mrf.mxu0  ;;  %v1505_v32 = vpop.f32.mrf.mxu2 }
 0x1e9   : > { %v1492_v33 = vpop.f32.mrf.mxu1  ;;  %v1549_v34 = vpop.f32.mrf.mxu3 }
 0x1ed   : > { %1584 = vrot.lane.b32.xlu2 %v2536_v28, %s2145_s10  ;;  %v905_v0 = vpop.permute.xlu2 %904 }
 0x1ee   : > { %1596 = vrot.lane.b32.xlu0 %v2536_v28, %s2146_s11 }
 0x1f0   : > { %v1560_v26 = vpop.f32.mrf.mxu0 }
 0x1f1   : > { %v1578_v40 = vadd.f32 %v1560_v26, %v1508_v39  ;;  %v1573_v41 = vpop.f32.mrf.mxu1 }
 0x1f2   : > { %v1579_v57 = vadd.f32 %v1573_v41, %v1509_v56 }
 0x1f3   : > { %1609 = vrot.lane.b32.xlu1 %v1578_v40, %s2138_s25 }
 0x1f5   : > { %1593 = vrot.lane.b32.xlu2 %v2536_v28, %s2147_s12  ;;  %v882_v42 = vpop.permute.xlu1 %881  ;;  %v914_v3 = vpop.permute.xlu2 %913 }
 0x1f6   : > { %1606 = vrot.lane.b32.xlu0 %v1578_v40, %s2149_s14  ;;  %v879_v44 = vpop.permute.xlu0 %878 }
 0x1f7   : > { %v934_v48 = vsel %vm933_vm11, %v2506_v20, %v879_v44 }
 0x1f8   : > { %v1562_v45 = vpop.f32.mrf.mxu0  ;;  %v936_v50 = vsel %vm935_vm12, %v934_v48, %v882_v42 }
 0x1f9   : > { %v1575_v47 = vpop.f32.mrf.mxu1  ;;  %v938_v55 = vsel %vm937_vm13, %v936_v50, %v885_v43 }
 0x1fb   : > { %1618 = vrot.lane.b32.xlu1 %v1578_v40, %s2154_s28 }
 0x1fd   : > { %1615 = vrot.lane.b32.xlu2 %v1578_v40, %s2151_s22  ;;  %v891_v51 = vpop.permute.xlu1 %890  ;;  %v924_v11 = vpop.permute.xlu2 %923 }
 0x1fe   : > { %1612 = vrot.lane.b32.xlu0 %v1578_v40, %s2140_s27  ;;  %v888_v52 = vpop.permute.xlu0 %887 }
 0x1ff   : > { %v940_v20 = vsel %vm939_vm14, %v938_v55, %v888_v52 }
 0x200   : > { %v942_v58 = vsel %vm941_vm15, %v940_v20, %v891_v51 }
 0x201   : > { %v944_v62 = vsel %vm943_vm1, %v942_v58, %v894_v54 }
 0x203   : > { %1625 = vrot.lane.b32.xlu1 %v1578_v40, %s2152_s23 }
 0x205   : > { %1627 = vrot.lane.b32.xlu2 %v1579_v57, %s2152_s23  ;;  %v900_v59 = vpop.permute.xlu1 %899 }
 0x206   : > { %1621 = vrot.lane.b32.xlu0 %v1578_v40, %s2153_s26  ;;  %v898_v60 = vpop.permute.xlu0 %897 }
 0x207   : > { %v902_v61 = vsel %vm901_vm0, %v898_v60, %v900_v59 }
 0x208   : > { %v946_v63 = vsel %vm945_vm2, %v944_v62, %v902_v61 }
 0x209   : > { %957 = vst [vmem:[#allocation2 + $0x10] sm:$0xff] %v946_v63 }
 0x20b   : > { %1600 = vrot.lane.b32.xlu1 %v2536_v28, %s2150_s21 }
 0x20d   : > { %1602 = vrot.lane.b32.xlu2 %v1578_v40, %s2150_s21  ;;  %v911_v1 = vpop.permute.xlu1 %910 }
 0x20e   : > { %1631 = vrot.lane.b32.xlu0 %v1579_v57, %s2155_s29  ;;  %v908_v2 = vpop.permute.xlu0 %907 }
 0x20f   : > { %v947_v4 = vsel %vm933_vm11, %v905_v0, %v908_v2 }
 0x210   : > { %v948_v7 = vsel %vm935_vm12, %v947_v4, %v911_v1 }
 0x211   : > { %v949_v8 = vsel %vm937_vm13, %v948_v7, %v914_v3 }
 0x215   : > { %v920_v5 = vpop.permute.xlu1 %919 }
 0x216   : > { %v917_v6 = vpop.permute.xlu0 %916 }
 0x217   : > { %v950_v10 = vsel %vm939_vm14, %v949_v8, %v917_v6 }
 0x218   : > { %v951_v13 = vsel %vm941_vm15, %v950_v10, %v920_v5 }
 0x21d   : > { %v931_v15 = vpop.permute.xlu1 %930 }
 0x21e   : > { %v926_v12 = vpop.permute.xlu0 %925 }
 0x21f   : > { %v928_v14 = vsel %vm927_vm3, %v924_v11, %v926_v12 }
 0x220   : > { %v952_v16 = vsel %vm943_vm1, %v951_v13, %v928_v14 }
 0x221   : > { %v953_v35 = vsel %vm945_vm2, %v952_v16, %v931_v15 }
 0x222   : > { %958 = vst [vmem:[#allocation2] sm:$0xff] %v953_v35  ;;  %v960_v36 = vadd.f32 %v953_v35, %v946_v63 }
 0x235   : > { %961 = vadd.xlane.f32.xlu1 %v960_v36 }
 0x23f   : > { %v1582_v17 = vpop.permute.xlu2 %1581 }
 0x240   : > { %v1634_v31 = vsel %vm933_vm11, %v2536_v28, %v1582_v17 }
 0x247   : > { %v1585_v18 = vpop.permute.xlu2 %1584 }
 0x248   : > { %v1635_v34 = vsel %vm935_vm12, %v1634_v31, %v1585_v18 }
 0x24f   : > { %v1594_v22 = vpop.permute.xlu2 %1593 }
 0x257   : > { %v1588_v21 = vpop.permute.xlu1 %1587  ;;  %v1616_v25 = vpop.permute.xlu2 %1615 }
 0x258   : > { %v1591_v19 = vpop.permute.xlu0 %1590  ;;  %v1636_v37 = vsel %vm937_vm13, %v1635_v34, %v1588_v21 }
 0x259   : > { %v1637_v40 = vsel %vm939_vm14, %v1636_v37, %v1591_v19 }
 0x25a   : > { %v1638_v42 = vsel %vm941_vm15, %v1637_v40, %v1594_v22 }
 0x25f   : > { %v1628_v30 = vpop.permute.xlu2 %1627 }
 0x260   : > { %v1597_v9 = vpop.permute.xlu0 %1596 }
 0x261   : > { %v1639_v45 = vsel %vm943_vm1, %v1638_v42, %v1597_v9 }
 0x265   : > { %v1610_v23 = vpop.permute.xlu1 %1609 }
 0x267   : > { %v1603_v43 = vpop.permute.xlu2 %1602 }
 0x268   : > { %v1607_v24 = vpop.permute.xlu0 %1606 }
 0x269   : > { %v1641_v32 = vsel %vm933_vm11, %v1607_v24, %v1610_v23 }
 0x26d   : > { %v1619_v27 = vpop.permute.xlu1 %1618 }
 0x270   : > { %v1613_v29 = vpop.permute.xlu0 %1612 }
 0x271   : > { %v1642_v38 = vsel %vm935_vm12, %v1641_v32, %v1613_v29 }
 0x272   : > { %v1643_v26 = vsel %vm937_vm13, %v1642_v38, %v1616_v25 }
 0x273   : > { %v1644_v41 = vsel %vm939_vm14, %v1643_v26, %v1619_v27 }
 0x275   : > { %v1626_v33 = vpop.permute.xlu1 %1625 }
 0x276   : > { %v1629_v47 = vsel %vm927_vm3, %v1626_v33, %v1628_v30 }
 0x278   : > { %v1622_v39 = vpop.permute.xlu0 %1621 }
 0x279   : > { %v1645_v28 = vsel %vm941_vm15, %v1644_v41, %v1622_v39 }
 0x27a   : > { %v1646_v49 = vsel %vm943_vm1, %v1645_v28, %v1629_v47 }
 0x27d   : > { %v1601_v44 = vpop.permute.xlu1 %1600 }
 0x27e   : > { %v1604_v46 = vsel %vm901_vm0, %v1601_v44, %v1603_v43 }
 0x27f   : > { %v1640_v48 = vsel %vm945_vm2, %v1639_v45, %v1604_v46 }
 0x280   : > { %v1632_v50 = vpop.permute.xlu0 %1631  ;;  %1995 = vst [vmem:[#allocation2 + $0x18] sm:$0xff] %v1640_v48 }
 0x281   : > { %v1647_v51 = vsel %vm945_vm2, %v1646_v49, %v1632_v50 }
 0x282   : > { %1996 = vst [vmem:[#allocation2 + $0x8] sm:$0xff] %v1647_v51  ;;  %v1654_v52 = vadd.f32 %v1647_v51, %v1640_v48 }
 0x284   : > { %1655 = vadd.xlane.f32.xlu2 %v1654_v52 }
 0x2a8   : > { %v962_v54 = vpop.xlane.xlu1 %961 }
 0x2a9   : > { %v963_v55 = vadd.f32 %v962_v54, %v959_v53 }
 0x2ab   : > { %965 = vst.msk [vmem:[#allocation3] sm:$0xff] %vm964_vm4, %v963_v55 }
 0x2b2   : > { %v1653_v56 = vld [vmem:[#allocation3] sm:$0xff] }
 0x2f7   : > { %v1656_v20 = vpop.xlane.xlu2 %1655 }
 0x2f8   : > { %v1657_v57 = vadd.f32 %v1656_v20, %v1653_v56 }
 0x2fa   : > { %1658 = vst.msk [vmem:[#allocation3] sm:$0xff] %vm964_vm4, %v1657_v57 }
 0x2fb PF: > { %1660 = sbr.rel (!%p235_p4) target bundleno = 773 (0x305), region = 48  ;;  %vm1663_vm5 = vcmask (%p235_p4), 7168  }
 0x301   : > { %v1661_v58 = vld [vmem:[#allocation3] sm:$0xff] }
 0x302   : > { %v1662_v59 = vmul.f32 0.001953125, %v1661_v58 }
 0x304   : > { %1664 = vst.msk [vmem:[#allocation5] sm:$0xff] %vm1663_vm5, %v1662_v59 }
 0x305 PF: > { %p1665_p6 = scmp.eq.s32.totalorder %s2125_s15, 1 }
 0x306   : > { %vm1670_vm6 = vcmask (%p1665_p6), 7168   ;;  %v2156_v60 = vmov (%p1665_p6), 0.0  }
 0x307   : > { %1669 = sbr.rel (!%p1665_p6) target bundleno = 780 (0x30c), region = 52  ;;  %1671 = vst.msk [vmem:[#allocation4] sm:$0xff] (%p1665_p6), %vm1670_vm6, %v2156_v60 }
 0x30c PF: > { %p1998_p7 = scmp.ne.s32.totalorder %s2125_s15, 1 }
 0x30e   : > { %1674 = sbr.rel (%p1998_p7) target bundleno = 1039 (0x40f), region = 56 }
 0x313   : > { %v1681_v61 = vld [vmem:[#allocation5] sm:$0xff]  ;;  %v2157_v62 = vmov 0   ;;  %v1680_v0 = vld [vmem:[#allocation2] sm:$0xff]  ;;  %v1999_v7 = vld [vmem:[#allocation2 + $0x18] sm:$0xff]  ;;  %vm1696_vm7 = vcmask 7168  }
 0x314   : > { %2074 = vset.pattern.permute.xlu0 %v2157_v62  ;;  %v1679_v63 = vld [vmem:[#allocation2 + $0x10] sm:$0xff]  ;;  %v2000_v8 = vld [vmem:[#allocation2 + $0x8] sm:$0xff] }
 0x315   : > { %1684 = vperm.xlu0 %2074, %v1681_v61   ;;  %v1689_v16 = vld [vmem:[#allocation4] sm:$0xff] }
 0x31d   : > { %1707 = vperm.xlu0 %2074, %v1681_v61  }
 0x387   : > { %v1685_v1 = vpop.permute.xlu0 %1684 }
 0x388   : > { %v1687_v2 = vsub.f32 %v1679_v63, %v1685_v1  ;;  %v1688_v3 = vsub.f32 %v1680_v0, %v1685_v1 }
 0x38a   : > { %v1690_v4 = vmul.f32 %v1687_v2, %v1687_v2  ;;  %v1691_v5 = vmul.f32 %v1688_v3, %v1688_v3 }
 0x38c   : > { %v1692_v6 = vadd.f32 %v1691_v5, %v1690_v4 }
 0x38e   : > { %1693 = vadd.xlane.f32.xlu1 %v1692_v6 }
 0x38f   : > { %v1708_v10 = vpop.permute.xlu0 %1707 }
 0x390   : > { %v1710_v11 = vsub.f32 %v1999_v7, %v1708_v10  ;;  %v1711_v12 = vsub.f32 %v2000_v8, %v1708_v10 }
 0x392   : > { %v1713_v13 = vmul.f32 %v1710_v11, %v1710_v11  ;;  %v1714_v14 = vmul.f32 %v1711_v12, %v1711_v12 }
 0x394   : > { %v1715_v15 = vadd.f32 %v1714_v14, %v1713_v13 }
 0x396   : > { %1716 = vadd.xlane.f32.xlu1 %v1715_v15 }
 0x401   : > { %v1694_v35 = vpop.xlane.xlu1 %1693 }
 0x402   : > { %v1695_v36 = vadd.f32 %v1694_v35, %v1689_v16 }
 0x404   : > { %1697 = vst.msk [vmem:[#allocation4] sm:$0xff] %vm1696_vm7, %v1695_v36 }
 0x409   : > { %v1717_v18 = vpop.xlane.xlu1 %1716 }
 0x40b   : > { %v1712_v17 = vld [vmem:[#allocation4] sm:$0xff] }
 0x40c   : > { %v1718_v19 = vadd.f32 %v1717_v18, %v1712_v17 }
 0x40e   : > { %1719 = vst.msk [vmem:[#allocation4] sm:$0xff] %vm1696_vm7, %v1718_v19 }
 0x40f PF: > { %1721 = sbr.rel (!%p1665_p6) target bundleno = 1075 (0x433), region = 60  ;;  %v1735_v31 = vld [vmem:[%s2630_s2] sm:$0xff] (%p1665_p6)  ;;  %vm1737_vm11 = vcmask (%p1665_p6), 7168   ;;  %v1740_v33 = vld [vmem:[#allocation5] sm:$0xff] (%p1665_p6) }
 0x410   : > { %v1739_v38 = vld [vmem:[%s2631_s3] sm:$0xff] (%p1665_p6) }
 0x415   : > { %v1722_v21 = vld [vmem:[#allocation4] sm:$0xff] }
 0x416   : > { %v1723_v22 = vmul.f32 0.001953125, %v1722_v21 }
 0x418   : > { %v1724_v9 = vadd.f32 1e-05, %v1723_v22 }
 0x41a   : > { %2075 = vrsqrt.f32 %v1724_v9  ;;  %vm1731_vm8 = vweird.f32 %v1724_v9 }
 0x420   : > { %v2076_v23 = vpop.eup %2075 }
 0x421   : > { %v1726_v24 = vmul.f32 %v2076_v23, %v1724_v9  ;;  %vm1732_vm9 = vweird.f32 %v2076_v23 }
 0x422   : > { %vm1733_vm10 = vmor %vm1731_vm8, %vm1732_vm9 }
 0x423   : > { %v1727_v25 = vmul.f32 %v2076_v23, %v1726_v24 }
 0x425   : > { %v1728_v27 = vmul.f32 0.5, %v1727_v25 }
 0x427   : > { %v1729_v29 = vsub.f32 1.5, %v1728_v27 }
 0x429   : > { %v1730_v30 = vmul.f32 %v2076_v23, %v1729_v29 }
 0x42b   : > { %v1734_v32 = vsel %vm1733_vm10, %v2076_v23, %v1730_v30 }
 0x42c   : > { %v1736_v34 = vmul.f32 %v1735_v31, %v1734_v32 }
 0x42e   : > { %1738 = vst.msk [vmem:[#allocation6] sm:$0xff] %vm1737_vm11, %v1736_v34  ;;  %v1741_v37 = vmul.f32 %v1740_v33, %v1736_v34 }
 0x430   : > { %v1742_v39 = vsub.f32 %v1739_v38, %v1741_v37 }
 0x432   : > { %1743 = vst.msk [vmem:[#allocation7] sm:$0xff] %vm1737_vm11, %v1742_v39 }
 0x433 PF: > { %p2001_p8 = scmp.ne.s32.totalorder %s2125_s15, 2 }
 0x435   : > { %1747 = sbr.rel (%p2001_p8) target bundleno = 1216 (0x4c0), region = 64 }
 0x43a   : > { %v1762_v26 = vld [vmem:[#allocation7] sm:$0xff]  ;;  %v1754_v40 = vld [vmem:[#allocation6] sm:$0xff]  ;;  %v2158_v41 = vmov 0   ;;  %v1752_v42 = vld [vmem:[#allocation2 + $0x10] sm:$0xff] }
 0x43b   : > { %2078 = vset.pattern.permute.xlu1 %v2158_v41  ;;  %2077 = vset.pattern.permute.xlu0 %v2158_v41  ;;  %v1753_v43 = vld [vmem:[#allocation2] sm:$0xff]  ;;  %v2002_v51 = vld [vmem:[#allocation2 + $0x18] sm:$0xff]  ;;  %v2003_v52 = vld [vmem:[#allocation2 + $0x8] sm:$0xff] }
 0x43c   : > { %1765 = vperm.xlu1 %2078, %v1762_v26   ;;  %1757 = vperm.xlu0 %2077, %v1754_v40  }
 0x444   : > { %1795 = vperm.xlu1 %2078, %v1762_v26   ;;  %1787 = vperm.xlu0 %2077, %v1754_v40  }
 0x4ae   : > { %v1766_v28 = vpop.permute.xlu1 %1765  ;;  %v1758_v44 = vpop.permute.xlu0 %1757 }
 0x4af   : > { %v1760_v45 = vmul.f32 %v1758_v44, %v1752_v42  ;;  %v1761_v46 = vmul.f32 %v1758_v44, %v1753_v43 }
 0x4b1   : > { %v1768_v47 = vadd.f32 %v1766_v28, %v1760_v45  ;;  %v1769_v48 = vadd.f32 %v1766_v28, %v1761_v46 }
 0x4b3   : > { %vm1770_vm12 = vcmp.ge.f32.partialorder %v1768_v47, 0.0  ;;  %vm1771_vm13 = vcmp.ge.f32.partialorder %v1769_v48, 0.0  ;;  %v1772_v49 = vmul.f32 0.2, %v1768_v47  ;;  %v1773_v50 = vmul.f32 0.2, %v1769_v48 }
 0x4b5   : > { %v1774_v53 = vsel %vm1770_vm12, %v1768_v47, %v1772_v49  ;;  %v1775_v54 = vsel %vm1771_vm13, %v1769_v48, %v1773_v50 }
 0x4b6   : > { %1776 = vst [vmem:[#allocation8] sm:$0xff] %v1774_v53  ;;  %v1788_v55 = vpop.permute.xlu0 %1787  ;;  %v1796_v57 = vpop.permute.xlu1 %1795 }
 0x4b7   : > { %1777 = vst [vmem:[#allocation8 + $0x8] sm:$0xff] %v1775_v54  ;;  %v1790_v56 = vmul.f32 %v2002_v51, %v1788_v55  ;;  %v1791_v20 = vmul.f32 %v2003_v52, %v1788_v55 }
 0x4b9   : > { %v1798_v58 = vadd.f32 %v1796_v57, %v1790_v56  ;;  %v1799_v59 = vadd.f32 %v1796_v57, %v1791_v20 }
 0x4bb   : > { %vm1800_vm14 = vcmp.ge.f32.partialorder %v1798_v58, 0.0  ;;  %vm1801_vm15 = vcmp.ge.f32.partialorder %v1799_v59, 0.0  ;;  %v1802_v60 = vmul.f32 0.2, %v1798_v58  ;;  %v1803_v61 = vmul.f32 0.2, %v1799_v59 }
 0x4bd   : > { %v1804_v62 = vsel %vm1800_vm14, %v1798_v58, %v1802_v60  ;;  %v1805_v63 = vsel %vm1801_vm15, %v1799_v59, %v1803_v61 }
 0x4be   : > { %2004 = vst [vmem:[#allocation8 + $0x10] sm:$0xff] %v1804_v62 }
 0x4bf   : > { %2005 = vst [vmem:[#allocation8 + $0x18] sm:$0xff] %v1805_v63 }
 0x4c0 PF: > { %p2020_p9 = scmp.eq.s32.totalorder %s1916_s18, 2  ;;  %s1827_s6 = sshll.u32 %s2632_s4, 4  ;;  %s1828_s6 = int_to_ptr.hbm [resolvable:$true] %s1827_s6 }
 0x4c1   : > { %s2159_s7 = smov [#allocation8]   ;;  %s2160_s9 = smov 256  }
 0x4c2   : > { %s1825_s8 = sshll.u32 %s2159_s7, 4  ;;  %s2161_s10 = smov 16   ;;  %s1826_s8 = int_to_ptr.vmem [resolvable:$true] %s1825_s8 }
 0x4c3   : > { %2013 = dma.vmem_to_hbm [thread:$0]  (%p2020_p9), %s1826_s8, 512, %s1828_s6, [#allocation9], %s2160_s9, %s2160_s9, %s2161_s10  }
 0x4c4 PF: > { %p2021_p10 = scmp.ge.s32.totalorder %s2133_s17, 2  ;;  %p2022_p11 = scmp.eq.s32.totalorder %s1917_s19, 2 }
 0x4c6   : > { %p2017_p12 = pnand %p2022_p11, %p2021_p10 }
 0x4c8   : > { %p2018_p13 = pneg %p2017_p12 }
 0x4ca   : > { %2120 = dma.done.wait (%p2018_p13), [#allocation9], 512  }
 0x4cb   : > { %2122 = vsyncadd (%p2018_p13), [#allocation9], 4294966784  ;;  %s17_s17 = sadd.s32 1, %s2133_s17   ;;  %s2633_s15 = smov %s2129_s16 }
 0x4cc   : > { %p14_p0 = scmp.ge.s32.totalorder %s17_s17, 5   ;;  %s2634_s16 = smov %s2636_s20 }
 0x4ce   :  { %16 = sbr.rel (!%p14_p0) target bundleno = 3 (0x3), region = 115 }
 0x4d3   :  { %1849 = vsyncpa [#allocation9], 1 }
 0x4d4   :  { %1851 = vsyncpa [#allocation9 + $0x1], 1 }

</bundles_post_ra>
